<compile_context>
chip_gen: v6e
topology: v6e:2x2x1
jax: 0.10.0
libtpu: 0.0.40
codegen_flags: <defaults>
</compile_context>

<pallas_src>
import jax
import jax.numpy as jnp
from jax.experimental import pallas as pl
from jax.experimental.pallas import tpu as pltpu


def _round_up(x, m):
    return ((x + m - 1) // m) * m


def pad_params(params, temp=1.0, compute_dtype=jnp.bfloat16):
    """Pad params to lane-aligned (multiple-of-128) output dims, fold 1/temp
    into fc3, and cast matmul operands to bf16.

    Hoisted out of the per-step path: call once after each optimizer update
    (or whenever `temp` changes) and reuse the result across actor steps.
    """
    w1, b1, w2, b2, w3, b3 = params
    f32 = jnp.float32
    d_in, h1 = w1.shape
    h2, na = w2.shape[1], w3.shape[1]
    h1_p, h2_p, a_p = _round_up(h1, 128), _round_up(h2, 128), _round_up(na, 128)
    inv_t = 1.0 / float(temp)
    # d_in (K dim of fc1) is intentionally NOT padded.
    w1p = jnp.pad(w1.astype(f32), ((0, 0), (0, h1_p - h1))).astype(compute_dtype)
    b1p = jnp.pad(b1.astype(f32), ((0, 0), (0, h1_p - h1)))
    w2p = jnp.pad(w2.astype(f32), ((0, h1_p - h1), (0, h2_p - h2))).astype(compute_dtype)
    b2p = jnp.pad(b2.astype(f32), ((0, 0), (0, h2_p - h2)))
    w3p = jnp.pad(w3.astype(f32) * inv_t, ((0, h2_p - h2), (0, a_p - na))).astype(compute_dtype)
    b3p = jnp.pad(b3.astype(f32) * inv_t, ((0, 0), (0, a_p - na)))
    return (w1p, b1p, w2p, b2p, w3p, b3p), na


def actor_forward(state_grid, padded_params, n_actions, tile_b=256):
    """Fused actor forward.  state_grid: [B, input_size] f32.
    Returns probs [B, n_actions] (the GLOBAL temperature softmax of the module).
    """
    w1p, b1p, w2p, b2p, w3p, b3p = padded_params
    B, d_in = state_grid.shape
    assert w1p.shape[0] == d_in
    h1_p, h2_p, a_p = w1p.shape[1], w2p.shape[1], w3p.shape[1]
    f32 = jnp.float32
    cdt = w1p.dtype  # matmul operand dtype (bf16)

    tb = min(tile_b, _round_up(B, 8))
    b_p = _round_up(B, tb)
    n_tiles = b_p // tb

    # Only activations are padded per step (weights were padded once in
    # pad_params).  Padded batch rows get masked to -inf before the GLOBAL
    # softmax and come out as exact zeros.
    xp = jnp.pad(state_grid.astype(f32), ((0, b_p - B), (0, 0))).astype(cdt)

    def kernel(x_ref, w1_ref, b1_ref, w2_ref, b2_ref, w3_ref, b3_ref,
               probs_ref, m_scr, l_scr):
        i = pl.program_id(0)

        @pl.when(i == 0)
        def _init():
            m_scr[...] = jnp.full_like(m_scr, -jnp.inf)   # running global max
            l_scr[...] = jnp.zeros_like(l_scr)            # running sum-exp @ max

        # --- MLP: bf16 operands on the MXU, f32 accumulation ----------------
        h1 = jnp.dot(x_ref[...], w1_ref[...], preferred_element_type=f32) + b1_ref[...]
        h1 = jnp.maximum(h1, 0.0)
        h2 = jnp.dot(h1.astype(cdt), w2_ref[...], preferred_element_type=f32) + b2_ref[...]
        h2 = jnp.maximum(h2, 0.0)
        # 1/temp is pre-folded into w3/b3, so these ARE the scaled logits.
        logits = jnp.dot(h2.astype(cdt), w3_ref[...], preferred_element_type=f32) + b3_ref[...]

        # Mask padded action lanes / padded batch rows out of the GLOBAL softmax.
        col = jax.lax.broadcasted_iota(jnp.int32, logits.shape, 1)
        row = jax.lax.broadcasted_iota(jnp.int32, logits.shape, 0) + i * tb
        scaled = jnp.where((col < n_actions) & (row < B), logits, -jnp.inf)

        # Stash this tile's logits into the VMEM-resident output block
        # (constant index map => written back to HBM only once, at the end).
        off = pl.multiple_of(i * tb, tb)
        probs_ref[pl.ds(off, tb), :] = scaled

        # Online log-sum-exp accumulation of the global (max, sum).
        # Every tile has >= 1 valid entry (b_p - tb < B), so m_tile is finite.
        m_tile = jnp.max(scaled, keepdims=True)                       # (1, 1)
        l_tile = jnp.sum(jnp.exp(scaled - m_tile), keepdims=True)     # (1, 1)
        m_old, l_old = m_scr[...], l_scr[...]
        m_new = jnp.maximum(m_old, m_tile)
        l_scr[...] = l_old * jnp.exp(m_old - m_new) + l_tile * jnp.exp(m_tile - m_new)
        m_scr[...] = m_new

        # Last tile: combine + normalize the whole resident block in place.
        @pl.when(i == pl.num_programs(0) - 1)
        def _finalize():
            inv = 1.0 / l_scr[...]           # exact scalar reciprocal
            probs_ref[...] = jnp.exp(probs_ref[...] - m_scr[...]) * inv

    def resident(arr):  # full-array block, constant index -> stays in VMEM
        nd = arr.ndim
        return pl.BlockSpec(arr.shape, lambda i: (0,) * nd)

    def nbytes(a):
        return a.size * a.dtype.itemsize

    cost = pl.CostEstimate(
        flops=2 * b_p * (d_in * h1_p + h1_p * h2_p + h2_p * a_p) + 8 * b_p * a_p,
        transcendentals=2 * b_p * a_p,
        bytes_accessed=int(sum(nbytes(a) for a in
                               (xp, w1p, b1p, w2p, b2p, w3p, b3p)) + 4 * b_p * a_p),
    )

    probs_p = pl.pallas_call(
        kernel,
        grid=(n_tiles,),
        out_shape=jax.ShapeDtypeStruct((b_p, a_p), f32),
        in_specs=[
            pl.BlockSpec((tb, d_in), lambda i: (i, 0)),   # x tile (pipelined)
            resident(w1p), resident(b1p),                 # fc1 (VMEM-resident)
            resident(w2p), resident(b2p),                 # fc2
            resident(w3p), resident(b3p),                 # fc3 (1/temp folded in)
        ],
        # Whole output stays resident in VMEM across the grid (b_p * 128 * 4 B);
        # stays far under the scoped limit on v5e/v6e/v7x for any sane batch.
        out_specs=pl.BlockSpec((b_p, a_p), lambda i: (0, 0)),
        scratch_shapes=[pltpu.VMEM((1, 1), f32),          # running max
                        pltpu.VMEM((1, 1), f32)],         # running sum-exp
        compiler_params=pltpu.CompilerParams(
            # Sequential online reduction + resident output => "arbitrary".
            dimension_semantics=("arbitrary",),
            vmem_limit_bytes=32 * 1024 * 1024,
        ),
        cost_estimate=cost,
    )(xp, w1p, b1p, w2p, b2p, w3p, b3p)

    # TODO(synk): torch.distributions.Categorical has no Pallas equivalent; we
    # return the probability tensor that parameterizes it.
    return probs_p[:B, :n_actions]


def init_params(key, input_size, fc1_output_dim, fc2_output_dim, n_actions):
    """Deterministic synthetic init (PyTorch-Linear-like uniform fan-in scaling)."""
    ks = jax.random.split(key, 6)

    def linear(kw, kb, fan_in, fan_out):
        bound = 1.0 / jnp.sqrt(jnp.float32(fan_in))
        w = jax.random.uniform(kw, (fan_in, fan_out), jnp.float32, -bound, bound)
        b = jax.random.uniform(kb, (1, fan_out), jnp.float32, -bound, bound)
        return w, b

    w1, b1 = linear(ks[0], ks[1], input_size, fc1_output_dim)
    w2, b2 = linear(ks[2], ks[3], fc1_output_dim, fc2_output_dim)
    w3, b3 = linear(ks[4], ks[5], fc2_output_dim, n_actions)
    return (w1, b1, w2, b2, w3, b3)


def reference_forward(state_grid, params, temp=1.0):
    """Plain-JAX f32 reference matching the PyTorch module exactly (global softmax)."""
    w1, b1, w2, b2, w3, b3 = params
    x1 = jnp.maximum(state_grid @ w1 + b1, 0.0)
    x2 = jnp.maximum(x1 @ w2 + b2, 0.0)
    x3 = x2 @ w3 + b3
    scaled = x3 / temp
    norm = scaled - jnp.max(scaled)
    e = jnp.exp(norm)
    return e / jnp.sum(e)


if __name__ == "__main__":
    # batch=192 with tile_b=128 spans two batch tiles (the second partly padded)
    # -> exercises the online global-softmax reduction and the row/col masking.
    batch = 192
    input_size = 32
    fc1_output_dim = 256
    fc2_output_dim = 128
    n_actions = 8
    temp = 1.0

    key = jax.random.PRNGKey(0)
    kx, kp = jax.random.split(key)
    state_grid = jax.random.normal(kx, (batch, input_size), dtype=jnp.float32)
    params = init_params(kp, input_size, fc1_output_dim, fc2_output_dim, n_actions)

    # Hoisted out of the per-step path: pad / bf16-cast / temp-fold once.
    padded_params, _ = pad_params(params, temp=temp)

    probs = jax.block_until_ready(
        actor_forward(state_grid, padded_params, n_actions, tile_b=128))

    ref = reference_forward(state_grid, params, temp=temp)
    assert probs.shape == (batch, n_actions)
    # bf16 matmul operands (f32 accumulation) vs. the f32 PyTorch-equivalent reference.
    assert jnp.allclose(probs, ref, atol=2e-5, rtol=1e-1), "mismatch vs reference"
    assert bool(jnp.all(probs >= 0.0)), "probabilities must be non-negative"
    # Exact reciprocal => global softmax sums to 1 to ~f32 rounding.
    assert abs(float(jnp.sum(probs)) - 1.0) < 1e-4, "global softmax should sum to 1"

    print("KERNEL_OK")
</pallas_src>

<mosaic_0001>
module attributes {stable_mosaic.version = 11 : i64} {
  func.func @kernel(%arg0: i32, %arg1: memref<128x32xbf16, #tpu.memory_space<vmem>>, %arg2: memref<32x256xbf16, #tpu.memory_space<vmem>>, %arg3: memref<1x256xf32, #tpu.memory_space<vmem>>, %arg4: memref<256x128xbf16, #tpu.memory_space<vmem>>, %arg5: memref<1x128xf32, #tpu.memory_space<vmem>>, %arg6: memref<128x128xbf16, #tpu.memory_space<vmem>>, %arg7: memref<1x128xf32, #tpu.memory_space<vmem>>, %arg8: memref<256x128xf32, #tpu.memory_space<vmem>>, %arg9: memref<1x1xf32, #tpu.memory_space<vmem>>, %arg10: memref<1x1xf32, #tpu.memory_space<vmem>>) attributes {dimension_semantics = [#tpu.dimension_semantics<arbitrary>], iteration_bounds = array<i64: 2>, scalar_prefetch = 0 : i64, scratch_operands = 2 : i64, tpu.core_type = #tpu.core_type<tc>, window_params = [{transform_indices = @transform_0, window_bounds = array<i64: 128, 32>}, {pipeline_mode = #tpu.pipeline_mode<synchronous>, transform_indices = @transform_1, window_bounds = array<i64: 32, 256>}, {pipeline_mode = #tpu.pipeline_mode<synchronous>, transform_indices = @transform_2, window_bounds = array<i64: 1, 256>}, {pipeline_mode = #tpu.pipeline_mode<synchronous>, transform_indices = @transform_3, window_bounds = array<i64: 256, 128>}, {pipeline_mode = #tpu.pipeline_mode<synchronous>, transform_indices = @transform_4, window_bounds = array<i64: 1, 128>}, {pipeline_mode = #tpu.pipeline_mode<synchronous>, transform_indices = @transform_5, window_bounds = array<i64: 128, 128>}, {pipeline_mode = #tpu.pipeline_mode<synchronous>, transform_indices = @transform_6, window_bounds = array<i64: 1, 128>}, {pipeline_mode = #tpu.pipeline_mode<synchronous>, transform_indices = @transform_7, window_bounds = array<i64: 256, 128>}]} {
    %c0_i32 = arith.constant 0 : i32
    %0 = arith.cmpi eq, %arg0, %c0_i32 : i32
    %1 = arith.extui %0 : i1 to i32
    %c0_i32_0 = arith.constant 0 : i32
    %2 = arith.cmpi ne, %1, %c0_i32_0 : i32
    scf.if %2 {
      %cst_32 = arith.constant 0xFF800000 : f32
      %69 = vector.broadcast %cst_32 : f32 to vector<1x1xf32>
      %c0_33 = arith.constant 0 : index
      %c0_34 = arith.constant 0 : index
      %70 = vector.load %arg9[%c0_33, %c0_34] : memref<1x1xf32, #tpu.memory_space<vmem>>, vector<1x1xf32>
      tpu.vector_store %arg9[%c0_33, %c0_34], %69 {strides = array<i32>} : memref<1x1xf32, #tpu.memory_space<vmem>>, vector<1x1xf32>,
      %cst_35 = arith.constant 0.000000e+00 : f32
      %71 = vector.broadcast %cst_35 : f32 to vector<1x1xf32>
      %c0_36 = arith.constant 0 : index
      %c0_37 = arith.constant 0 : index
      %72 = vector.load %arg10[%c0_36, %c0_37] : memref<1x1xf32, #tpu.memory_space<vmem>>, vector<1x1xf32>
      tpu.vector_store %arg10[%c0_36, %c0_37], %71 {strides = array<i32>} : memref<1x1xf32, #tpu.memory_space<vmem>>, vector<1x1xf32>,
    } else {
    }
    %c0 = arith.constant 0 : index
    %c0_1 = arith.constant 0 : index
    %3 = vector.load %arg1[%c0, %c0_1] : memref<128x32xbf16, #tpu.memory_space<vmem>>, vector<128x32xbf16>
    %c0_2 = arith.constant 0 : index
    %c0_3 = arith.constant 0 : index
    %4 = vector.load %arg2[%c0_2, %c0_3] : memref<32x256xbf16, #tpu.memory_space<vmem>>, vector<32x256xbf16>
    %cst = arith.constant dense<0.000000e+00> : vector<128x256xf32>
    %5 = tpu.matmul %3, %4, %cst {dimension_numbers = #tpu.dot_dimension_numbers<[1], [0], [0], [1], [0, 0, 1, 1], [], []>} : vector<128x32xbf16>, vector<32x256xbf16>, vector<128x256xf32> -> vector<128x256xf32>
    %c0_4 = arith.constant 0 : index
    %c0_5 = arith.constant 0 : index
    %6 = vector.load %arg3[%c0_4, %c0_5] : memref<1x256xf32, #tpu.memory_space<vmem>>, vector<1x256xf32>
    %7 = vector.broadcast %6 : vector<1x256xf32> to vector<128x256xf32>
    %8 = arith.addf %5, %7 : vector<128x256xf32>
    %cst_6 = arith.constant 0.000000e+00 : f32
    %9 = vector.broadcast %cst_6 : f32 to vector<128x256xf32>
    %10 = arith.maximumf %8, %9 : vector<128x256xf32>
    %11 = arith.truncf %10 : vector<128x256xf32> to vector<128x256xbf16>
    %c0_7 = arith.constant 0 : index
    %c0_8 = arith.constant 0 : index
    %12 = vector.load %arg4[%c0_7, %c0_8] : memref<256x128xbf16, #tpu.memory_space<vmem>>, vector<256x128xbf16>
    %cst_9 = arith.constant dense<0.000000e+00> : vector<128x128xf32>
    %13 = tpu.matmul %11, %12, %cst_9 {dimension_numbers = #tpu.dot_dimension_numbers<[1], [0], [0], [1], [0, 0, 1, 1], [], []>} : vector<128x256xbf16>, vector<256x128xbf16>, vector<128x128xf32> -> vector<128x128xf32>
    %c0_10 = arith.constant 0 : index
    %c0_11 = arith.constant 0 : index
    %14 = vector.load %arg5[%c0_10, %c0_11] : memref<1x128xf32, #tpu.memory_space<vmem>>, vector<1x128xf32>
    %15 = vector.broadcast %14 : vector<1x128xf32> to vector<128x128xf32>
    %16 = arith.addf %13, %15 : vector<128x128xf32>
    %cst_12 = arith.constant 0.000000e+00 : f32
    %17 = vector.broadcast %cst_12 : f32 to vector<128x128xf32>
    %18 = arith.maximumf %16, %17 : vector<128x128xf32>
    %19 = arith.truncf %18 : vector<128x128xf32> to vector<128x128xbf16>
    %c0_13 = arith.constant 0 : index
    %c0_14 = arith.constant 0 : index
    %20 = vector.load %arg6[%c0_13, %c0_14] : memref<128x128xbf16, #tpu.memory_space<vmem>>, vector<128x128xbf16>
    %cst_15 = arith.constant dense<0.000000e+00> : vector<128x128xf32>
    %21 = tpu.matmul %19, %20, %cst_15 {dimension_numbers = #tpu.dot_dimension_numbers<[1], [0], [0], [1], [0, 0, 1, 1], [], []>} : vector<128x128xbf16>, vector<128x128xbf16>, vector<128x128xf32> -> vector<128x128xf32>
    %c0_16 = arith.constant 0 : index
    %c0_17 = arith.constant 0 : index
    %22 = vector.load %arg7[%c0_16, %c0_17] : memref<1x128xf32, #tpu.memory_space<vmem>>, vector<1x128xf32>
    %23 = vector.broadcast %22 : vector<1x128xf32> to vector<128x128xf32>
    %24 = arith.addf %21, %23 : vector<128x128xf32>
    %25 = tpu.iota {dimensions = array<i32: 1>} : vector<128x128xi32>
    %26 = tpu.iota {dimensions = array<i32: 0>} : vector<128x128xi32>
    %c128_i32 = arith.constant 128 : i32
    %27 = arith.muli %arg0, %c128_i32 : i32
    %28 = vector.broadcast %27 : i32 to vector<128x128xi32>
    %29 = arith.addi %26, %28 : vector<128x128xi32>
    %c8_i32 = arith.constant 8 : i32
    %30 = vector.broadcast %c8_i32 : i32 to vector<128x128xi32>
    %31 = arith.cmpi slt, %25, %30 : vector<128x128xi32>
    %c192_i32 = arith.constant 192 : i32
    %32 = vector.broadcast %c192_i32 : i32 to vector<128x128xi32>
    %33 = arith.cmpi slt, %29, %32 : vector<128x128xi32>
    %34 = arith.andi %31, %33 : vector<128x128xi1>
    %cst_18 = arith.constant 0xFF800000 : f32
    %35 = vector.broadcast %cst_18 : f32 to vector<128x128xf32>
    %36 = arith.select %34, %24, %35 : vector<128x128xi1>, vector<128x128xf32>
    %c128_i32_19 = arith.constant 128 : i32
    %37 = arith.muli %arg0, %c128_i32_19 : i32
    %38 = tpu.assume_multiple %37, 128 : i32
    %39 = arith.index_cast %38 : i32 to index
    %c0_20 = arith.constant 0 : index
    %40 = vector.load %arg8[%39, %c0_20] : memref<256x128xf32, #tpu.memory_space<vmem>>, vector<128x128xf32>
    tpu.vector_store %arg8[%39, %c0_20], %36 {strides = array<i32>} : memref<256x128xf32, #tpu.memory_space<vmem>>, vector<128x128xf32>,
    %41 = vector.shape_cast %36 : vector<128x128xf32> to vector<1x128x128xf32>
    %cst_21 = arith.constant dense<0xFF800000> : vector<1xf32>
    %42 = vector.multi_reduction <maximumf>, %41, %cst_21 [1, 2] : vector<1x128x128xf32> to vector<1xf32>
    %43 = vector.shape_cast %42 : vector<1xf32> to vector<1x1x1xf32>
    %44 = vector.extract %43[0, 0, 0] : f32 from vector<1x1x1xf32>
    %45 = vector.broadcast %44 : f32 to vector<1x1xf32>
    %46 = vector.broadcast %45 : vector<1x1xf32> to vector<128x128xf32>
    %47 = arith.subf %36, %46 : vector<128x128xf32>
    %48 = math.exp %47 : vector<128x128xf32>
    %49 = vector.shape_cast %48 : vector<128x128xf32> to vector<1x128x128xf32>
    %cst_22 = arith.constant dense<0.000000e+00> : vector<1xf32>
    %50 = vector.multi_reduction <add>, %49, %cst_22 [1, 2] : vector<1x128x128xf32> to vector<1xf32>
    %51 = vector.shape_cast %50 : vector<1xf32> to vector<1x1x1xf32>
    %52 = vector.extract %51[0, 0, 0] : f32 from vector<1x1x1xf32>
    %53 = vector.broadcast %52 : f32 to vector<1x1xf32>
    %c0_23 = arith.constant 0 : index
    %c0_24 = arith.constant 0 : index
    %54 = vector.load %arg9[%c0_23, %c0_24] : memref<1x1xf32, #tpu.memory_space<vmem>>, vector<1x1xf32>
    %c0_25 = arith.constant 0 : index
    %c0_26 = arith.constant 0 : index
    %55 = vector.load %arg10[%c0_25, %c0_26] : memref<1x1xf32, #tpu.memory_space<vmem>>, vector<1x1xf32>
    %56 = arith.maximumf %54, %45 : vector<1x1xf32>
    %57 = arith.subf %54, %56 : vector<1x1xf32>
    %58 = math.exp %57 : vector<1x1xf32>
    %59 = arith.mulf %55, %58 : vector<1x1xf32>
    %60 = arith.subf %45, %56 : vector<1x1xf32>
    %61 = math.exp %60 : vector<1x1xf32>
    %62 = arith.mulf %53, %61 : vector<1x1xf32>
    %63 = arith.addf %59, %62 : vector<1x1xf32>
    %c0_27 = arith.constant 0 : index
    %c0_28 = arith.constant 0 : index
    %64 = vector.load %arg10[%c0_27, %c0_28] : memref<1x1xf32, #tpu.memory_space<vmem>>, vector<1x1xf32>
    tpu.vector_store %arg10[%c0_27, %c0_28], %63 {strides = array<i32>} : memref<1x1xf32, #tpu.memory_space<vmem>>, vector<1x1xf32>,
    %c0_29 = arith.constant 0 : index
    %c0_30 = arith.constant 0 : index
    %65 = vector.load %arg9[%c0_29, %c0_30] : memref<1x1xf32, #tpu.memory_space<vmem>>, vector<1x1xf32>
    tpu.vector_store %arg9[%c0_29, %c0_30], %56 {strides = array<i32>} : memref<1x1xf32, #tpu.memory_space<vmem>>, vector<1x1xf32>,
    %c1_i32 = arith.constant 1 : i32
    %66 = arith.cmpi eq, %arg0, %c1_i32 : i32
    %67 = arith.extui %66 : i1 to i32
    %c0_i32_31 = arith.constant 0 : i32
    %68 = arith.cmpi ne, %67, %c0_i32_31 : i32
    scf.if %68 {
      %c0_32 = arith.constant 0 : index
      %c0_33 = arith.constant 0 : index
      %69 = vector.load %arg10[%c0_32, %c0_33] : memref<1x1xf32, #tpu.memory_space<vmem>>, vector<1x1xf32>
      %cst_34 = arith.constant 1.000000e+00 : f32
      %70 = vector.broadcast %cst_34 : f32 to vector<1x1xf32>
      %71 = arith.divf %70, %69 : vector<1x1xf32>
      %c0_35 = arith.constant 0 : index
      %c0_36 = arith.constant 0 : index
      %72 = vector.load %arg8[%c0_35, %c0_36] : memref<256x128xf32, #tpu.memory_space<vmem>>, vector<256x128xf32>
      %c0_37 = arith.constant 0 : index
      %c0_38 = arith.constant 0 : index
      %73 = vector.load %arg9[%c0_37, %c0_38] : memref<1x1xf32, #tpu.memory_space<vmem>>, vector<1x1xf32>
      %74 = vector.broadcast %73 : vector<1x1xf32> to vector<256x128xf32>
      %75 = arith.subf %72, %74 : vector<256x128xf32>
      %76 = math.exp %75 : vector<256x128xf32>
      %77 = vector.broadcast %71 : vector<1x1xf32> to vector<256x128xf32>
      %78 = arith.mulf %76, %77 : vector<256x128xf32>
      %c0_39 = arith.constant 0 : index
      %c0_40 = arith.constant 0 : index
      %79 = vector.load %arg8[%c0_39, %c0_40] : memref<256x128xf32, #tpu.memory_space<vmem>>, vector<256x128xf32>
      tpu.vector_store %arg8[%c0_39, %c0_40], %78 {strides = array<i32>} : memref<256x128xf32, #tpu.memory_space<vmem>>, vector<256x128xf32>,
    } else {
    }
    return
  }
  func.func @transform_0(%arg0: i32) -> (i32, i32) {
    %c0_i32 = arith.constant 0 : i32
    %c0_i32_0 = arith.constant 0 : i32
    return %arg0, %c0_i32 : i32, i32
  }
  func.func @transform_1(%arg0: i32) -> (i32, i32) {
    %c0_i32 = arith.constant 0 : i32
    %c0_i32_0 = arith.constant 0 : i32
    %c0_i32_1 = arith.constant 0 : i32
    return %c0_i32, %c0_i32_0 : i32, i32
  }
  func.func @transform_2(%arg0: i32) -> (i32, i32) {
    %c0_i32 = arith.constant 0 : i32
    %c0_i32_0 = arith.constant 0 : i32
    %c0_i32_1 = arith.constant 0 : i32
    return %c0_i32, %c0_i32_0 : i32, i32
  }
  func.func @transform_3(%arg0: i32) -> (i32, i32) {
    %c0_i32 = arith.constant 0 : i32
    %c0_i32_0 = arith.constant 0 : i32
    %c0_i32_1 = arith.constant 0 : i32
    return %c0_i32, %c0_i32_0 : i32, i32
  }
  func.func @transform_4(%arg0: i32) -> (i32, i32) {
    %c0_i32 = arith.constant 0 : i32
    %c0_i32_0 = arith.constant 0 : i32
    %c0_i32_1 = arith.constant 0 : i32
    return %c0_i32, %c0_i32_0 : i32, i32
  }
  func.func @transform_5(%arg0: i32) -> (i32, i32) {
    %c0_i32 = arith.constant 0 : i32
    %c0_i32_0 = arith.constant 0 : i32
    %c0_i32_1 = arith.constant 0 : i32
    return %c0_i32, %c0_i32_0 : i32, i32
  }
  func.func @transform_6(%arg0: i32) -> (i32, i32) {
    %c0_i32 = arith.constant 0 : i32
    %c0_i32_0 = arith.constant 0 : i32
    %c0_i32_1 = arith.constant 0 : i32
    return %c0_i32, %c0_i32_0 : i32, i32
  }
  func.func @transform_7(%arg0: i32) -> (i32, i32) {
    %c0_i32 = arith.constant 0 : i32
    %c0_i32_0 = arith.constant 0 : i32
    %c0_i32_1 = arith.constant 0 : i32
    return %c0_i32, %c0_i32_0 : i32, i32
  }
}

</mosaic_0001>

<bundles_post_ra>
// kernel: tpu_custom_call.1
= control target key start
LH: loop header
LB: loop body
LE: loop exit
PB: predicated region body
PF: predicated region fallthrough
CT: control target
= control target key end

     0   :  { %12 = vsyncpa [#allocation5], 0  ;;  %s2450_s0 = inlined_call_operand.vmem [shape: bf16[256,32], index: 0, kind: input, shape index: {}]   ;;  %s2451_s1 = inlined_call_operand.vmem [shape: bf16[32,256], index: 1, kind: input, shape index: {}]   ;;  %s2452_s2 = inlined_call_operand.vmem [shape: f32[1,256], index: 2, kind: input, shape index: {}]   ;;  %s2453_s3 = inlined_call_operand.vmem [shape: bf16[256,128], index: 3, kind: input, shape index: {}]   ;;  %s2454_s4 = inlined_call_operand.vmem [shape: f32[1,128], index: 4, kind: input, shape index: {}]   ;;  %s2455_s5 = inlined_call_operand.hbm [shape: bf16[128,128], index: 5, kind: input, shape index: {}]   ;;  %s2456_s6 = inlined_call_operand.vmem [shape: f32[1,128], index: 6, kind: input, shape index: {}]   ;;  %s2457_s7 = inlined_call_operand.hbm [shape: f32[256,128], index: 7, kind: output, shape index: {}]  }
   0x1   :  { %13 = vsyncpa [#allocation6], 0  ;;  %s1957_s24 = smov 0  }
   0x2 LB: > { %s1963_s25 = sadd.s32 4294967295, %s1905_s24   ;;  %p1489_p0 = scmp.ge.s32.totalorder %s1905_s24, 1  ;;  %s1905_s24 = sphi %s1957_s24, %s19_s24  }
   0x3   : > { %p197_p1 = scmp.lt.s32.totalorder %s1905_s24, 3  ;;  %s1907_s26 = smov [#allocation4]  }
   0x4   : > { %s221_s27 = sshll.u32 %s1907_s26, 4  ;;  %p1678_p4 = scmp.eq.s32.totalorder %s1963_s25, 0  ;;  %s222_s27 = int_to_ptr.vmem [resolvable:$true] %s221_s27 }
   0x5   : > { %p1968_p3 = pnand %p1489_p0, %p197_p1  ;;  %s1852_s29 = scalar_lea.vmem %s222_s27, 1024 }
   0x6   : > { %p1853_p8 = scmp.ne.s32.totalorder %s222_s27, %s1852_s29  ;;  %p1860_p11 = scmp.lt.s32.totalorder %s222_s27, %s222_s27 }
   0x7   : > { %p1674_p5 = pneg %p1968_p3  ;;  %p1861_p12 = scmp.lt.s32.totalorder %s1852_s29, %s1852_s29 }
   0x9   : > { %p1675_p6 = pnand %p1678_p4, %p1674_p5  ;;  %p1862_p13 = por %p1861_p12, %p1860_p11 }
   0xb   : > { %p1843_p7 = pneg %p1675_p6 }
   0xd   : > { %p1855_p9 = pnand %p1853_p8, %p1843_p7 }
   0xf   : > { %p1856_p10 = pneg %p1855_p9 }
  0x11   : > { %p1863_p2 = pnand %p1862_p13, %p1856_p10 }
  0x13   : > { %1866 = shalt.err (!%p1863_p2)
}
  0x14   : > { %s1908_s30 = smov 64   ;;  %s1909_s8 = smov 4  }
  0x15   : > { %1677 = dma.hbm_to_vmem [thread:$0]  (!%p1675_p6), %s2455_s5, 1024, %s222_s27, [#allocation5], %s1908_s30, %s1908_s30, %s1909_s8  }
  0x16   : > { %249 = sbr.rel (%p1968_p3) target bundleno = 1373 (0x55d), region = 48 }
  0x1b   : > { %1896 = dma.done.wait (%p1678_p4), [#allocation5], 1024  }
  0x1c   : > { %1898 = vsyncadd (%p1678_p4), [#allocation5], 4294966272  ;;  %s1494_s11 = sshll.u32 %s1963_s25, 4  ;;  %p2459_p1 = scmp.ne.s32.totalorder %s1963_s25, 0 }
  0x1d   : > { %p277_p0 = scmp.lt.s32.totalorder %s1494_s11, 31 }
  0x1e   : > { %286 = sbr.rel (%p2459_p1) target bundleno = 37 (0x25), region = 56 }
  0x1f   : > { %s2461_s11 = smov (!%p277_p0, %s1494_s11), 31 }
  0x20   : > { %s1495_s12 = sshll.u32 %s2461_s11, 2 }
  0x21   : > { %s1990_s15 = scalar_lea.vmem %s2450_s0, %s1495_s12 }
  0x23   : > { %vm287_vm0 = vcmask 0   ;;  %v1910_v0 = vmov -inf   ;;  %v1911_v1 = vmov 0.0  }
  0x24   : > { %288 = vst.msk [vmem:[#allocation2] sm:$0x1] %vm287_vm0, %v1910_v0  ;;  %289 = vst.msk [vmem:[#allocation3] sm:$0x1] %vm287_vm0, %v1911_v1 }
  0x25 PF: > { %v1700_v2 = vld [vmem:[%s2451_s1 + $0x14] ss:$8 sps:$4 sm:$0xff]   ;;  %v1702_v3 = vld [vmem:[%s2451_s1 + $0x10] ss:$8 sps:$4 sm:$0xff]   ;;  %v1912_v4 = vmov 0   ;;  %v1706_v7 = vld [vmem:[%s1990_s15] sm:$0xff]   ;;  %v312_v34 = vlaneseq }
  0x26   : > { %439 = vmatprep.mubr.bf16.mxu0 %v1912_v4  ;;  %419 = vmatprep.subr.bf16.mxu0 %v1700_v2  ;;  %v1703_v5 = vld [vmem:[%s2451_s1 + $0x4] ss:$8 sps:$4 sm:$0xff]   ;;  %v1705_v6 = vld [vmem:[%s2451_s1] ss:$8 sps:$4 sm:$0xff]   ;;  %vm382_vm1 = vcmask 261120   ;;  %v1714_v8 = vld [vmem:[%s2453_s3 + $0x78] sm:$0xff]  }
  0x27   : > { %420 = vmatpush1.bf16.msra.mxu0 %v1702_v3  ;;  %v1707_v9 = vld [vmem:[%s1990_s15 + $0x8] sm:$0xff]   ;;  %v1715_v10 = vld [vmem:[%s2453_s3 + $0x38] sm:$0xff]   ;;  %1550 = vmatprep.subr.bf16.mxu1 %v1714_v8  ;;  %v1716_v11 = vld [vmem:[%s2453_s3 + $0x70] sm:$0xff]   ;;  %v2071_v35 = vshrl.u32 %v312_v34, 7  ;;  %s1543_s19 = sshll.u32 %s1963_s25, 7  ;;  %p1544_p2 = scmp.ne.s32.totalorder %s1963_s25, 1 }
  0x28   : > { %421 = vmatprep.subr.bf16.mxu0 %v1703_v5  ;;  %1551 = vmatpush3.bf16.msra.mxu1 %v1715_v10  ;;  %v1717_v12 = vld [vmem:[%s2453_s3 + $0x30] sm:$0xff]   ;;  %v1718_v13 = vld [vmem:[%s2453_s3 + $0x68] sm:$0xff]   ;;  %v1720_v15 = vld [vmem:[%s2453_s3 + $0x60] sm:$0xff]   ;;  %s2165_s22 = scalar_lea.vmem [#allocation7], %s1543_s19 }
  0x29   : > { %1552 = vmatprep.subr.bf16.mxu1 %v1716_v11  ;;  %v1719_v14 = vld [vmem:[%s2453_s3 + $0x28] sm:$0xff]   ;;  %v1708_v16 = vld [vmem:[%s1990_s15 + $0x10] sm:$0xff]   ;;  %v1721_v17 = vld [vmem:[%s2453_s3 + $0x20] sm:$0xff]   ;;  %v318_v36 = vsub.s32 1, %v2071_v35  ;;  %v314_v37 = vsub.s32 0, %v2071_v35 }
  0x2a   : > { %v1722_v18 = vld [vmem:[%s2453_s3 + $0x58] sm:$0xff]   ;;  %v1710_v21 = vld [vmem:[%s1990_s15 + $0x20] sm:$0xff]   ;;  %v1711_v22 = vld [vmem:[%s1990_s15 + $0x28] sm:$0xff]  }
  0x2b   : > { %422 = vmatpush1.bf16.msra.mxu0 %v1705_v6  ;;  %v1723_v19 = vld [vmem:[%s2453_s3 + $0x18] sm:$0xff]   ;;  %v1712_v23 = vld [vmem:[%s1990_s15 + $0x30] sm:$0xff]   ;;  %v1726_v27 = vld [vmem:[%s2453_s3 + $0x48] sm:$0xff]  }
  0x2c   : > { %1553 = vmatpush3.bf16.msra.mxu1 %v1717_v12  ;;  %v1709_v20 = vld [vmem:[%s1990_s15 + $0x18] sm:$0xff]   ;;  %v1724_v25 = vld [vmem:[%s2453_s3 + $0x50] sm:$0xff]   ;;  %v1727_v28 = vld [vmem:[%s2453_s3 + $0x8] sm:$0xff]  }
  0x2d   : > { %1554 = vmatprep.subr.bf16.mxu1 %v1718_v13  ;;  %v1713_v24 = vld [vmem:[%s1990_s15 + $0x38] sm:$0xff]   ;;  %v1725_v26 = vld [vmem:[%s2453_s3 + $0x10] sm:$0xff]   ;;  %v1728_v29 = vld [vmem:[%s2453_s3 + $0x40] sm:$0xff]  }
  0x2e   : > { %1509 = vmatmul.mubr.msk.bf16.vlgmr.msra.gmra.mxu0 %vm382_vm1, %v1706_v7  ;;  %v1729_v30 = vld [vmem:[%s2453_s3] sm:$0xff]   ;;  %v1731_v32 = vld [vmem:[#allocation4 + $0x30] sm:$0xff]   ;;  %v1732_v33 = vld [vmem:[#allocation4 + $0x28] sm:$0xff]  }
  0x2f   : > { %449 = vmatprep.mubr.bf16.mxu0 %v1912_v4  ;;  %v1730_v31 = vld [vmem:[#allocation4 + $0x38] sm:$0xff]  }
  0x30   : > { %1555 = vmatpush3.bf16.msra.mxu1 %v1719_v14  ;;  %1630 = vmatprep.subr.bf16.mxu0 %v1730_v31  ;;  %v310_v38 = vld [vmem:[%s2452_s2] sm:$0x3] }
  0x31   : > { %1556 = vmatprep.subr.bf16.mxu1 %v1720_v15  ;;  %1631 = vmatpush3.bf16.msra.mxu0 %v1730_v31  ;;  %v2078_v40 = vrot.slane %v310_v38, %v318_v36  ;;  %v2082_v41 = vrot.slane %v310_v38, %v314_v37 }
  0x32   : > { %1632 = vmatprep.subr.bf16.mxu0 %v1731_v32 }
  0x34   : > { %1557 = vmatpush3.bf16.msra.mxu1 %v1721_v17 }
  0x35   : > { %1558 = vmatprep.subr.bf16.mxu1 %v1722_v18  ;;  %1633 = vmatpush3.bf16.msra.mxu0 %v1731_v32 }
  0x36   : > { %1510 = vmatmul.mubr.msk.bf16.gmra.mxu0 %vm382_vm1, %v1707_v9  ;;  %1634 = vmatprep.subr.bf16.mxu0 %v1732_v33 }
  0x37   : > { %459 = vmatprep.mubr.bf16.mxu0 %v1912_v4 }
  0x38   : > { %1559 = vmatpush3.bf16.msra.mxu1 %v1723_v19 }
  0x39   : > { %1560 = vmatprep.subr.bf16.mxu1 %v1724_v25  ;;  %1635 = vmatpush3.bf16.msra.mxu0 %v1732_v33 }
  0x3c   : > { %1561 = vmatpush3.bf16.msra.mxu1 %v1725_v26 }
  0x3d   : > { %1562 = vmatprep.subr.bf16.mxu1 %v1726_v27 }
  0x3e   : > { %1511 = vmatmul.mubr.msk.bf16.gmra.mxu0 %vm382_vm1, %v1708_v16 }
  0x3f   : > { %469 = vmatprep.mubr.bf16.mxu0 %v1912_v4 }
  0x40   : > { %1563 = vmatpush3.bf16.msra.mxu1 %v1727_v28 }
  0x41   : > { %1564 = vmatprep.subr.bf16.mxu1 %v1728_v29 }
  0x44   : > { %1565 = vmatpush3.bf16.msra.mxu1 %v1729_v30 }
  0x46   : > { %1512 = vmatmul.mubr.msk.bf16.gmra.mxu0 %vm382_vm1, %v1709_v20 }
  0x47   : > { %479 = vmatprep.mubr.bf16.mxu0 %v1912_v4 }
  0x4e   : > { %1513 = vmatmul.mubr.msk.bf16.gmra.mxu0 %vm382_vm1, %v1710_v21 }
  0x4f   : > { %489 = vmatprep.mubr.bf16.mxu0 %v1912_v4 }
  0x56   : > { %1514 = vmatmul.mubr.msk.bf16.gmra.mxu0 %vm382_vm1, %v1711_v22 }
  0x57   : > { %499 = vmatprep.mubr.bf16.mxu0 %v1912_v4 }
  0x5e   : > { %1515 = vmatmul.mubr.msk.bf16.gmra.mxu0 %vm382_vm1, %v1712_v23 }
  0x5f   : > { %509 = vmatprep.mubr.bf16.mxu0 %v1912_v4 }
  0x66   : > { %1516 = vmatmul.mubr.msk.bf16.gmra.mxu0 %vm382_vm1, %v1713_v24 }
  0xee   : > { %v441_v39 = vpop.f32.mrf.mxu0 }
  0xef   : > { %v442_v46 = vadd.f32 %v441_v39, %v2082_v41 }
  0xf0   : > { %v443_v42 = vpop.f32.mrf.mxu0 }
  0xf1   : > { %v444_v44 = vadd.f32 %v443_v42, %v2078_v40  ;;  %v520_v53 = vmax.f32 %v442_v46, 0.0 }
  0xf2   : > { %v445_v43 = vpop.f32.mrf.mxu0 }
  0xf3   : > { %v446_v45 = vadd.f32 %v445_v43, %v2082_v41  ;;  %v521_v51 = vmax.f32 %v444_v44, 0.0 }
  0xf4   : > { %v447_v47 = vpop.f32.mrf.mxu0 }
  0xf5   : > { %v448_v48 = vadd.f32 %v447_v47, %v2078_v40  ;;  %v522_v49 = vmax.f32 %v446_v45, 0.0 }
  0xf6   : > { %v451_v50 = vpop.f32.mrf.mxu0 }
  0xf7   : > { %v523_v52 = vmax.f32 %v448_v48, 0.0  ;;  %v552_v56 = vpack.c.bf16 %v522_v49, %v520_v53  ;;  %v452_v60 = vadd.f32 %v451_v50, %v2082_v41 }
  0xf8   : > { %v453_v54 = vpop.f32.mrf.mxu0 }
  0xf9   : > { %v553_v55 = vpack.c.bf16 %v523_v52, %v521_v51  ;;  %v454_v58 = vadd.f32 %v453_v54, %v2078_v40  ;;  %v524_v3 = vmax.f32 %v452_v60, 0.0 }
  0xfa   : > { %v455_v57 = vpop.f32.mrf.mxu0 }
  0xfb   : > { %v456_v59 = vadd.f32 %v455_v57, %v2082_v41  ;;  %735 = vmatprep.mubr.bf16.mxu1 %v553_v55  ;;  %v525_v1 = vmax.f32 %v454_v58, 0.0 }
  0xfc   : > { %v457_v61 = vpop.f32.mrf.mxu0  ;;  %736 = vmatmul.mubr.bf16.vlgmr.msra.gmra.mxu1 %v552_v56 }
  0xfd   : > { %v458_v62 = vadd.f32 %v457_v61, %v2078_v40  ;;  %v526_v63 = vmax.f32 %v456_v59, 0.0 }
  0xfe   : > { %v461_v0 = vpop.f32.mrf.mxu0 }
  0xff   : > { %v527_v2 = vmax.f32 %v458_v62, 0.0  ;;  %v554_v6 = vpack.c.bf16 %v526_v63, %v524_v3  ;;  %v462_v10 = vadd.f32 %v461_v0, %v2082_v41 }
 0x100   : > { %v463_v4 = vpop.f32.mrf.mxu0 }
 0x101   : > { %v555_v5 = vpack.c.bf16 %v527_v2, %v525_v1  ;;  %v464_v8 = vadd.f32 %v463_v4, %v2078_v40  ;;  %v528_v17 = vmax.f32 %v462_v10, 0.0 }
 0x102   : > { %v465_v7 = vpop.f32.mrf.mxu0 }
 0x103   : > { %v466_v9 = vadd.f32 %v465_v7, %v2082_v41  ;;  %743 = vmatprep.mubr.bf16.mxu1 %v555_v5  ;;  %v529_v15 = vmax.f32 %v464_v8, 0.0 }
 0x104   : > { %v467_v11 = vpop.f32.mrf.mxu0  ;;  %744 = vmatmul.mubr.bf16.gmra.mxu1 %v554_v6 }
 0x105   : > { %v468_v12 = vadd.f32 %v467_v11, %v2078_v40  ;;  %v530_v13 = vmax.f32 %v466_v9, 0.0 }
 0x106   : > { %v471_v14 = vpop.f32.mrf.mxu0 }
 0x107   : > { %v531_v16 = vmax.f32 %v468_v12, 0.0  ;;  %v556_v20 = vpack.c.bf16 %v530_v13, %v528_v17  ;;  %v472_v24 = vadd.f32 %v471_v14, %v2082_v41 }
 0x108   : > { %v473_v18 = vpop.f32.mrf.mxu0 }
 0x109   : > { %v557_v19 = vpack.c.bf16 %v531_v16, %v529_v15  ;;  %v474_v22 = vadd.f32 %v473_v18, %v2078_v40  ;;  %v532_v31 = vmax.f32 %v472_v24, 0.0 }
 0x10a   : > { %v475_v21 = vpop.f32.mrf.mxu0 }
 0x10b   : > { %v476_v23 = vadd.f32 %v475_v21, %v2082_v41  ;;  %751 = vmatprep.mubr.bf16.mxu1 %v557_v19  ;;  %v533_v29 = vmax.f32 %v474_v22, 0.0 }
 0x10c   : > { %v477_v25 = vpop.f32.mrf.mxu0  ;;  %752 = vmatmul.mubr.bf16.gmra.mxu1 %v556_v20 }
 0x10d   : > { %v478_v26 = vadd.f32 %v477_v25, %v2078_v40  ;;  %v534_v27 = vmax.f32 %v476_v23, 0.0 }
 0x10e   : > { %v481_v28 = vpop.f32.mrf.mxu0 }
 0x10f   : > { %v535_v30 = vmax.f32 %v478_v26, 0.0  ;;  %v558_v36 = vpack.c.bf16 %v534_v27, %v532_v31  ;;  %v482_v43 = vadd.f32 %v481_v28, %v2082_v41  ;;  %v1734_v31 = vld [vmem:[#allocation4 + $0x18] sm:$0xff]  }
 0x110   : > { %v483_v32 = vpop.f32.mrf.mxu0 }
 0x111   : > { %v559_v33 = vpack.c.bf16 %v535_v30, %v533_v29  ;;  %v484_v39 = vadd.f32 %v483_v32, %v2078_v40  ;;  %v536_v50 = vmax.f32 %v482_v43, 0.0  ;;  %v1733_v30 = vld [vmem:[#allocation4 + $0x20] sm:$0xff]   ;;  %v1735_v32 = vld [vmem:[#allocation4 + $0x10] sm:$0xff]  }
 0x112   : > { %v485_v38 = vpop.f32.mrf.mxu0  ;;  %1636 = vmatprep.subr.bf16.mxu0 %v1733_v30 }
 0x113   : > { %v486_v42 = vadd.f32 %v485_v38, %v2082_v41  ;;  %759 = vmatprep.mubr.bf16.mxu1 %v559_v33  ;;  %v537_v48 = vmax.f32 %v484_v39, 0.0  ;;  %1637 = vmatpush3.bf16.msra.mxu0 %v1733_v30  ;;  %v2119_v39 = vld [vmem:[%s2454_s4] ss:$0 sm:$0xff] }
 0x114   : > { %v487_v44 = vpop.f32.mrf.mxu0  ;;  %760 = vmatmul.mubr.bf16.gmra.mxu1 %v558_v36  ;;  %1638 = vmatprep.subr.bf16.mxu0 %v1734_v31 }
 0x115   : > { %v488_v45 = vadd.f32 %v487_v44, %v2078_v40  ;;  %v538_v46 = vmax.f32 %v486_v42, 0.0 }
 0x116   : > { %v491_v47 = vpop.f32.mrf.mxu0 }
 0x117   : > { %v539_v49 = vmax.f32 %v488_v45, 0.0  ;;  %v560_v53 = vpack.c.bf16 %v538_v46, %v536_v50  ;;  %v492_v57 = vadd.f32 %v491_v47, %v2082_v41  ;;  %1639 = vmatpush3.bf16.msra.mxu0 %v1734_v31 }
 0x118   : > { %v493_v51 = vpop.f32.mrf.mxu0  ;;  %1640 = vmatprep.subr.bf16.mxu0 %v1735_v32 }
 0x119   : > { %v561_v52 = vpack.c.bf16 %v539_v49, %v537_v48  ;;  %v494_v55 = vadd.f32 %v493_v51, %v2078_v40  ;;  %v540_v0 = vmax.f32 %v492_v57, 0.0 }
 0x11a   : > { %v495_v54 = vpop.f32.mrf.mxu0 }
 0x11b   : > { %v496_v56 = vadd.f32 %v495_v54, %v2082_v41  ;;  %767 = vmatprep.mubr.bf16.mxu1 %v561_v52  ;;  %v541_v62 = vmax.f32 %v494_v55, 0.0  ;;  %1641 = vmatpush3.bf16.msra.mxu0 %v1735_v32 }
 0x11c   : > { %v497_v58 = vpop.f32.mrf.mxu0  ;;  %768 = vmatmul.mubr.bf16.gmra.mxu1 %v560_v53 }
 0x11d   : > { %v498_v59 = vadd.f32 %v497_v58, %v2078_v40  ;;  %v542_v60 = vmax.f32 %v496_v56, 0.0 }
 0x11e   : > { %v501_v61 = vpop.f32.mrf.mxu0 }
 0x11f   : > { %v543_v63 = vmax.f32 %v498_v59, 0.0  ;;  %v562_v3 = vpack.c.bf16 %v542_v60, %v540_v0  ;;  %v502_v7 = vadd.f32 %v501_v61, %v2082_v41 }
 0x120   : > { %v503_v1 = vpop.f32.mrf.mxu0 }
 0x121   : > { %v563_v2 = vpack.c.bf16 %v543_v63, %v541_v62  ;;  %v504_v5 = vadd.f32 %v503_v1, %v2078_v40  ;;  %v544_v14 = vmax.f32 %v502_v7, 0.0 }
 0x122   : > { %v505_v4 = vpop.f32.mrf.mxu0 }
 0x123   : > { %v506_v6 = vadd.f32 %v505_v4, %v2082_v41  ;;  %775 = vmatprep.mubr.bf16.mxu1 %v563_v2  ;;  %v545_v12 = vmax.f32 %v504_v5, 0.0 }
 0x124   : > { %v507_v8 = vpop.f32.mrf.mxu0  ;;  %776 = vmatmul.mubr.bf16.gmra.mxu1 %v562_v3 }
 0x125   : > { %v508_v9 = vadd.f32 %v507_v8, %v2078_v40  ;;  %v546_v10 = vmax.f32 %v506_v6, 0.0 }
 0x126   : > { %v511_v11 = vpop.f32.mrf.mxu0 }
 0x127   : > { %v547_v13 = vmax.f32 %v508_v9, 0.0  ;;  %v564_v17 = vpack.c.bf16 %v546_v10, %v544_v14  ;;  %v512_v21 = vadd.f32 %v511_v11, %v2082_v41 }
 0x128   : > { %v513_v15 = vpop.f32.mrf.mxu0 }
 0x129   : > { %v565_v16 = vpack.c.bf16 %v547_v13, %v545_v12  ;;  %v514_v19 = vadd.f32 %v513_v15, %v2078_v40  ;;  %v548_v27 = vmax.f32 %v512_v21, 0.0 }
 0x12a   : > { %v515_v18 = vpop.f32.mrf.mxu0 }
 0x12b   : > { %v516_v20 = vadd.f32 %v515_v18, %v2082_v41  ;;  %783 = vmatprep.mubr.bf16.mxu1 %v565_v16  ;;  %v549_v25 = vmax.f32 %v514_v19, 0.0  ;;  %v1736_v41 = vld [vmem:[#allocation4 + $0x8] sm:$0xff]  }
 0x12c   : > { %v517_v22 = vpop.f32.mrf.mxu0  ;;  %784 = vmatmul.mubr.bf16.gmra.mxu1 %v564_v17  ;;  %1642 = vmatprep.subr.bf16.mxu0 %v1736_v41 }
 0x12d   : > { %v518_v23 = vadd.f32 %v517_v22, %v2078_v40  ;;  %v550_v24 = vmax.f32 %v516_v20, 0.0  ;;  %1643 = vmatpush3.bf16.msra.mxu0 %v1736_v41  ;;  %v1737_v40 = vld [vmem:[#allocation4] sm:$0xff]  }
 0x12e   : > { %1644 = vmatprep.subr.bf16.mxu0 %v1737_v40 }
 0x12f   : > { %v551_v26 = vmax.f32 %v518_v23, 0.0  ;;  %v566_v29 = vpack.c.bf16 %v550_v24, %v548_v27 }
 0x131   : > { %v567_v28 = vpack.c.bf16 %v551_v26, %v549_v25  ;;  %1645 = vmatpush3.bf16.msra.mxu0 %v1737_v40 }
 0x133   : > { %791 = vmatprep.mubr.bf16.mxu1 %v567_v28 }
 0x134   : > { %792 = vmatmul.mubr.bf16.gmra.mxu1 %v566_v29 }
 0x1bc   : > { %v1566_v33 = vpop.f32.mrf.mxu1 }
 0x1be   : > { %v1567_v36 = vpop.f32.mrf.mxu1 }
 0x1bf   : > { %v1568_v38 = vadd.f32 %v1567_v36, %v1566_v33 }
 0x1c0   : > { %v1569_v42 = vpop.f32.mrf.mxu1 }
 0x1c1   : > { %v738_v44 = vadd.f32 %v1568_v38, %v2119_v39 }
 0x1c2   : > { %v1570_v43 = vpop.f32.mrf.mxu1 }
 0x1c3   : > { %v1571_v45 = vadd.f32 %v1570_v43, %v1569_v42  ;;  %v800_v49 = vmax.f32 %v738_v44, 0.0 }
 0x1c4   : > { %v1572_v46 = vpop.f32.mrf.mxu1 }
 0x1c5   : > { %v741_v47 = vadd.f32 %v1571_v45, %v2119_v39 }
 0x1c6   : > { %v1573_v48 = vpop.f32.mrf.mxu1 }
 0x1c7   : > { %v801_v50 = vmax.f32 %v741_v47, 0.0  ;;  %v1574_v51 = vadd.f32 %v1573_v48, %v1572_v46 }
 0x1c8   : > { %v1575_v52 = vpop.f32.mrf.mxu1 }
 0x1c9   : > { %v816_v53 = vpack.c.bf16 %v801_v50, %v800_v49  ;;  %v746_v55 = vadd.f32 %v1574_v51, %v2119_v39 }
 0x1ca   : > { %v1576_v54 = vpop.f32.mrf.mxu1 }
 0x1cb   : > { %v1577_v56 = vadd.f32 %v1576_v54, %v1575_v52  ;;  %1646 = vmatprep.mubr.bf16.mxu0 %v816_v53  ;;  %v802_v60 = vmax.f32 %v746_v55, 0.0 }
 0x1cc   : > { %v1578_v57 = vpop.f32.mrf.mxu1 }
 0x1cd   : > { %v749_v58 = vadd.f32 %v1577_v56, %v2119_v39 }
 0x1ce   : > { %v1579_v59 = vpop.f32.mrf.mxu1 }
 0x1cf   : > { %v803_v61 = vmax.f32 %v749_v58, 0.0  ;;  %v1580_v62 = vadd.f32 %v1579_v59, %v1578_v57 }
 0x1d0   : > { %v1581_v63 = vpop.f32.mrf.mxu1 }
 0x1d1   : > { %v817_v0 = vpack.c.bf16 %v803_v61, %v802_v60  ;;  %v754_v2 = vadd.f32 %v1580_v62, %v2119_v39 }
 0x1d2   : > { %v1582_v1 = vpop.f32.mrf.mxu1 }
 0x1d3   : > { %v1583_v3 = vadd.f32 %v1582_v1, %v1581_v63  ;;  %1647 = vmatmul.mubr.bf16.vlgmr.msra.gmra.mxu0 %v817_v0  ;;  %v804_v7 = vmax.f32 %v754_v2, 0.0 }
 0x1d4   : > { %v1584_v4 = vpop.f32.mrf.mxu1 }
 0x1d5   : > { %v757_v5 = vadd.f32 %v1583_v3, %v2119_v39  ;;  %v997_v3 = vadd.s32 16, %v2071_v35 }
 0x1d6   : > { %v1585_v6 = vpop.f32.mrf.mxu1 }
 0x1d7   : > { %v805_v8 = vmax.f32 %v757_v5, 0.0  ;;  %v1586_v9 = vadd.f32 %v1585_v6, %v1584_v4  ;;  %v2139_v4 = vstv %s1543_s19  ;;  %v2142_v5 = vand.u32 127, %v312_v34 }
 0x1d8   : > { %v1587_v10 = vpop.f32.mrf.mxu1  ;;  %v1015_v6 = vadd.s32 %v2139_v4, %v997_v3  ;;  %v1007_v3 = vadd.s32 96, %v2071_v35 }
 0x1d9   : > { %v818_v11 = vpack.c.bf16 %v805_v8, %v804_v7  ;;  %v762_v13 = vadd.f32 %v1586_v9, %v2119_v39  ;;  %v998_v7 = vadd.s32 24, %v2071_v35  ;;  %v1013_v8 = vadd.s32 %v2139_v4, %v2071_v35 }
 0x1da   : > { %v1588_v12 = vpop.f32.mrf.mxu1  ;;  %vm1029_vm2 = vcmp.lt.s32.totalorder %v2142_v5, 8  ;;  %vm1032_vm3 = vcmp.lt.s32.totalorder %v1015_v6, 192 }
 0x1db   : > { %v1589_v14 = vadd.f32 %v1588_v12, %v1587_v10  ;;  %1650 = vmatprep.mubr.bf16.mxu0 %v818_v11  ;;  %v806_v18 = vmax.f32 %v762_v13, 0.0  ;;  %v1016_v9 = vadd.s32 %v2139_v4, %v998_v7  ;;  %v2154_v10 = vld [vmem:[%s2456_s6] ss:$0 sm:$0xff]  ;;  %vm1030_vm4 = vcmp.lt.s32.totalorder %v1013_v8, 192  ;;  %vm1048_vm5 = vmand %vm1029_vm2, %vm1032_vm3 }
 0x1dc   : > { %v1590_v15 = vpop.f32.mrf.mxu1  ;;  %vm1046_vm7 = vmand %vm1029_vm2, %vm1030_vm4  ;;  %v1010_v8 = vadd.s32 120, %v2071_v35 }
 0x1dd   : > { %v765_v16 = vadd.f32 %v1589_v14, %v2119_v39  ;;  %vm1033_vm6 = vcmp.lt.s32.totalorder %v1016_v9, 192  ;;  %v1008_v9 = vadd.s32 104, %v2071_v35 }
 0x1de   : > { %v1591_v17 = vpop.f32.mrf.mxu1  ;;  %vm1049_vm9 = vmand %vm1029_vm2, %vm1033_vm6 }
 0x1df   : > { %v807_v19 = vmax.f32 %v765_v16, 0.0  ;;  %v1592_v20 = vadd.f32 %v1591_v17, %v1590_v15 }
 0x1e0   : > { %v1593_v21 = vpop.f32.mrf.mxu1 }
 0x1e1   : > { %v819_v22 = vpack.c.bf16 %v807_v19, %v806_v18  ;;  %v770_v24 = vadd.f32 %v1592_v20, %v2119_v39  ;;  %v1001_v19 = vadd.s32 48, %v2071_v35 }
 0x1e2   : > { %v1594_v23 = vpop.f32.mrf.mxu1 }
 0x1e3   : > { %v1595_v25 = vadd.f32 %v1594_v23, %v1593_v21  ;;  %1651 = vmatmul.mubr.bf16.gmra.mxu0 %v819_v22  ;;  %v808_v29 = vmax.f32 %v770_v24, 0.0  ;;  %v999_v23 = vadd.s32 32, %v2071_v35 }
 0x1e4   : > { %v1596_v26 = vpop.f32.mrf.mxu1 }
 0x1e5   : > { %v773_v27 = vadd.f32 %v1595_v25, %v2119_v39  ;;  %v1019_v25 = vadd.s32 %v2139_v4, %v1001_v19 }
 0x1e6   : > { %v1597_v28 = vpop.f32.mrf.mxu1 }
 0x1e7   : > { %v809_v30 = vmax.f32 %v773_v27, 0.0  ;;  %v1598_v31 = vadd.f32 %v1597_v28, %v1596_v26  ;;  %v1002_v26 = vadd.s32 56, %v2071_v35  ;;  %v1017_v27 = vadd.s32 %v2139_v4, %v999_v23 }
 0x1e8   : > { %v1599_v32 = vpop.f32.mrf.mxu1  ;;  %v1000_v28 = vadd.s32 40, %v2071_v35  ;;  %vm1036_vm11 = vcmp.lt.s32.totalorder %v1019_v25, 192 }
 0x1e9   : > { %v820_v41 = vpack.c.bf16 %v809_v30, %v808_v29  ;;  %v778_v33 = vadd.f32 %v1598_v31, %v2119_v39  ;;  %v1020_v29 = vadd.s32 %v2139_v4, %v1002_v26  ;;  %vm1034_vm12 = vcmp.lt.s32.totalorder %v1017_v27, 192  ;;  %vm1052_vm13 = vmand %vm1029_vm2, %vm1036_vm11 }
 0x1ea   : > { %v1600_v40 = vpop.f32.mrf.mxu1  ;;  %v1018_v30 = vadd.s32 %v2139_v4, %v1000_v28  ;;  %vm1050_vm15 = vmand %vm1029_vm2, %vm1034_vm12 }
 0x1eb   : > { %v1601_v36 = vadd.f32 %v1600_v40, %v1599_v32  ;;  %1654 = vmatprep.mubr.bf16.mxu0 %v820_v41  ;;  %v810_v44 = vmax.f32 %v778_v33, 0.0  ;;  %vm1037_vm14 = vcmp.lt.s32.totalorder %v1020_v29, 192 }
 0x1ec   : > { %v1602_v38 = vpop.f32.mrf.mxu1  ;;  %vm1035_vm0 = vcmp.lt.s32.totalorder %v1018_v30, 192  ;;  %vm1053_vm1 = vmand %vm1029_vm2, %vm1037_vm14 }
 0x1ed   : > { %v781_v42 = vadd.f32 %v1601_v36, %v2119_v39  ;;  %vm1051_vm3 = vmand %vm1029_vm2, %vm1035_vm0 }
 0x1ee   : > { %v1603_v43 = vpop.f32.mrf.mxu1 }
 0x1ef   : > { %v811_v45 = vmax.f32 %v781_v42, 0.0  ;;  %v1604_v46 = vadd.f32 %v1603_v43, %v1602_v38  ;;  %v1005_v43 = vadd.s32 80, %v2071_v35 }
 0x1f0   : > { %v1605_v47 = vpop.f32.mrf.mxu1 }
 0x1f1   : > { %v821_v48 = vpack.c.bf16 %v811_v45, %v810_v44  ;;  %v786_v50 = vadd.f32 %v1604_v46, %v2119_v39 }
 0x1f2   : > { %v1606_v49 = vpop.f32.mrf.mxu1 }
 0x1f3   : > { %v1607_v51 = vadd.f32 %v1606_v49, %v1605_v47  ;;  %1655 = vmatmul.mubr.bf16.gmra.mxu0 %v821_v48  ;;  %v812_v55 = vmax.f32 %v786_v50, 0.0  ;;  %v1003_v47 = vadd.s32 64, %v2071_v35  ;;  %v1023_v49 = vadd.s32 %v2139_v4, %v1005_v43 }
 0x1f4   : > { %v1608_v52 = vpop.f32.mrf.mxu1  ;;  %v1006_v50 = vadd.s32 88, %v2071_v35 }
 0x1f5   : > { %v789_v53 = vadd.f32 %v1607_v51, %v2119_v39  ;;  %v1021_v51 = vadd.s32 %v2139_v4, %v1003_v47  ;;  %vm1040_vm4 = vcmp.lt.s32.totalorder %v1023_v49, 192 }
 0x1f6   : > { %v1609_v54 = vpop.f32.mrf.mxu1  ;;  %vm1056_vm6 = vmand %vm1029_vm2, %vm1040_vm4 }
 0x1f7   : > { %v813_v56 = vmax.f32 %v789_v53, 0.0  ;;  %v1610_v57 = vadd.f32 %v1609_v54, %v1608_v52  ;;  %v1004_v52 = vadd.s32 72, %v2071_v35  ;;  %v1024_v53 = vadd.s32 %v2139_v4, %v1006_v50 }
 0x1f8   : > { %v1611_v58 = vpop.f32.mrf.mxu1 }
 0x1f9   : > { %v822_v59 = vpack.c.bf16 %v813_v56, %v812_v55  ;;  %v794_v61 = vadd.f32 %v1610_v57, %v2119_v39  ;;  %v1022_v54 = vadd.s32 %v2139_v4, %v1004_v52 }
 0x1fa   : > { %v1612_v60 = vpop.f32.mrf.mxu1 }
 0x1fb   : > { %v1613_v62 = vadd.f32 %v1612_v60, %v1611_v58  ;;  %1658 = vmatprep.mubr.bf16.mxu0 %v822_v59  ;;  %v814_v0 = vmax.f32 %v794_v61, 0.0 }
 0x1fd   : > { %v797_v63 = vadd.f32 %v1613_v62, %v2119_v39  ;;  %v996_v39 = vadd.s32 8, %v2071_v35 }
 0x1ff   : > { %v815_v1 = vmax.f32 %v797_v63, 0.0  ;;  %v1014_v34 = vadd.s32 %v2139_v4, %v996_v39  ;;  %v1009_v63 = vadd.s32 112, %v2071_v35  ;;  %v1025_v39 = vadd.s32 %v2139_v4, %v1007_v3 }
 0x201   : > { %v823_v2 = vpack.c.bf16 %v815_v1, %v814_v0  ;;  %vm1031_vm8 = vcmp.lt.s32.totalorder %v1014_v34, 192  ;;  %v1027_v7 = vadd.s32 %v2139_v4, %v1009_v63  ;;  %v1028_v34 = vadd.s32 %v2139_v4, %v1010_v8 }
 0x202   : > { %vm1047_vm10 = vmand %vm1029_vm2, %vm1031_vm8 }
 0x203   : > { %1659 = vmatmul.mubr.bf16.gmra.mxu0 %v823_v2  ;;  %vm1044_vm12 = vcmp.lt.s32.totalorder %v1027_v7, 192 }
 0x204   : > { %vm1060_vm14 = vmand %vm1029_vm2, %vm1044_vm12 }
 0x293   : > { %v1648_v11 = vpop.f32.mrf.mxu0 }
 0x294   : > { %v938_v12 = vadd.f32 %v1648_v11, %v2154_v10  ;;  %v1026_v11 = vadd.s32 %v2139_v4, %v1008_v9 }
 0x295   : > { %v929_v13 = vpop.f32.mrf.mxu0 }
 0x296   : > { %v2162_v14 = vsel %vm1048_vm5, %v938_v12, -inf  ;;  %v930_v15 = vadd.f32 %v2154_v10, %v929_v13  ;;  %vm1038_vm5 = vcmp.lt.s32.totalorder %v1021_v51, 192 }
 0x297   : > { %1081 = vst [vmem:[%s2165_s22 + $0x10] sm:$0xff] %v2162_v14  ;;  %v1649_v16 = vpop.f32.mrf.mxu0  ;;  %vm1054_vm8 = vmand %vm1029_vm2, %vm1038_vm5 }
 0x298   : > { %v2171_v17 = vsel %vm1046_vm7, %v930_v15, -inf  ;;  %v941_v18 = vadd.f32 %v1649_v16, %v2154_v10  ;;  %vm1041_vm7 = vcmp.lt.s32.totalorder %v1024_v53, 192 }
 0x299   : > { %1079 = vst [vmem:[%s2165_s22] sm:$0xff] %v2171_v17  ;;  %v932_v20 = vpop.f32.mrf.mxu0 }
 0x29a   : > { %v2179_v21 = vsel %vm1049_vm9, %v941_v18, -inf  ;;  %v933_v22 = vadd.f32 %v2154_v10, %v932_v20  ;;  %vm1039_vm9 = vcmp.lt.s32.totalorder %v1022_v54, 192 }
 0x29b   : > { %1082 = vst [vmem:[%s2165_s22 + $0x18] sm:$0xff] %v2179_v21  ;;  %vm1055_vm11 = vmand %vm1029_vm2, %vm1039_vm9 }
 0x29c   : > { %v2185_v24 = vsel %vm1047_vm10, %v933_v22, -inf  ;;  %vm1057_vm10 = vmand %vm1029_vm2, %vm1041_vm7 }
 0x29d   : > { %1080 = vst [vmem:[%s2165_s22 + $0x8] sm:$0xff] %v2185_v24 }
 0x2a3   : > { %v1652_v31 = vpop.f32.mrf.mxu0 }
 0x2a4   : > { %v954_v32 = vadd.f32 %v1652_v31, %v2154_v10 }
 0x2a5   : > { %v945_v41 = vpop.f32.mrf.mxu0 }
 0x2a6   : > { %v2200_v40 = vsel %vm1052_vm13, %v954_v32, -inf  ;;  %v946_v33 = vadd.f32 %v2154_v10, %v945_v41  ;;  %vm1042_vm13 = vcmp.lt.s32.totalorder %v1025_v39, 192 }
 0x2a7   : > { %1085 = vst [vmem:[%s2165_s22 + $0x30] sm:$0xff] %v2200_v40  ;;  %v1653_v36 = vpop.f32.mrf.mxu0  ;;  %vm1058_vm0 = vmand %vm1029_vm2, %vm1042_vm13  ;;  %v1097_v23 = vmax.f32 %v2162_v14, %v2200_v40 }
 0x2a8   : > { %v2207_v38 = vsel %vm1050_vm15, %v946_v33, -inf  ;;  %v957_v42 = vadd.f32 %v1653_v36, %v2154_v10  ;;  %vm1045_vm15 = vcmp.lt.s32.totalorder %v1028_v34, 192 }
 0x2a9   : > { %1083 = vst [vmem:[%s2165_s22 + $0x20] sm:$0xff] %v2207_v38  ;;  %v948_v44 = vpop.f32.mrf.mxu0  ;;  %v1095_v25 = vmax.f32 %v2171_v17, %v2207_v38 }
 0x2aa   : > { %v2215_v45 = vsel %vm1053_vm1, %v957_v42, -inf  ;;  %v949_v46 = vadd.f32 %v2154_v10, %v948_v44  ;;  %vm1043_vm1 = vcmp.lt.s32.totalorder %v1026_v11, 192 }
 0x2ab   : > { %1086 = vst [vmem:[%s2165_s22 + $0x38] sm:$0xff] %v2215_v45  ;;  %v1098_v4 = vmax.f32 %v2179_v21, %v2215_v45  ;;  %vm1059_vm4 = vmand %vm1029_vm2, %vm1043_vm1 }
 0x2ac   : > { %v2221_v48 = vsel %vm1051_vm3, %v949_v46, -inf  ;;  %vm1061_vm3 = vmand %vm1029_vm2, %vm1045_vm15  ;;  %vm1205_vm2 = vcmask 0  }
 0x2ad   : > { %1084 = vst [vmem:[%s2165_s22 + $0x28] sm:$0xff] %v2221_v48  ;;  %v1096_v26 = vmax.f32 %v2185_v24, %v2221_v48 }
 0x2b3   : > { %v1656_v55 = vpop.f32.mrf.mxu0 }
 0x2b4   : > { %v970_v56 = vadd.f32 %v1656_v55, %v2154_v10 }
 0x2b5   : > { %v961_v57 = vpop.f32.mrf.mxu0 }
 0x2b6   : > { %v2236_v58 = vsel %vm1056_vm6, %v970_v56, -inf  ;;  %v962_v59 = vadd.f32 %v2154_v10, %v961_v57 }
 0x2b7   : > { %1089 = vst [vmem:[%s2165_s22 + $0x50] sm:$0xff] %v2236_v58  ;;  %v1657_v60 = vpop.f32.mrf.mxu0  ;;  %v1101_v31 = vmax.f32 %v1097_v23, %v2236_v58 }
 0x2b8   : > { %v2243_v61 = vsel %vm1054_vm8, %v962_v59, -inf  ;;  %v973_v62 = vadd.f32 %v1657_v60, %v2154_v10  ;;  %v2319_v60 = vld [vmem:[#allocation2] sm:$0x1] }
 0x2b9   : > { %1087 = vst [vmem:[%s2165_s22 + $0x40] sm:$0xff] %v2243_v61  ;;  %v964_v0 = vpop.f32.mrf.mxu0  ;;  %v1099_v32 = vmax.f32 %v1095_v25, %v2243_v61 }
 0x2ba   : > { %v2251_v1 = vsel %vm1057_vm10, %v973_v62, -inf  ;;  %v965_v2 = vadd.f32 %v2154_v10, %v964_v0 }
 0x2bb   : > { %1090 = vst [vmem:[%s2165_s22 + $0x58] sm:$0xff] %v2251_v1  ;;  %v1102_v27 = vmax.f32 %v1098_v4, %v2251_v1 }
 0x2bc   : > { %v2257_v6 = vsel %vm1055_vm11, %v965_v2, -inf }
 0x2bd   : > { %1088 = vst [vmem:[%s2165_s22 + $0x48] sm:$0xff] %v2257_v6  ;;  %v1100_v41 = vmax.f32 %v1096_v26, %v2257_v6 }
 0x2c3   : > { %v1660_v12 = vpop.f32.mrf.mxu0 }
 0x2c4   : > { %v986_v13 = vadd.f32 %v1660_v12, %v2154_v10 }
 0x2c5   : > { %v977_v15 = vpop.f32.mrf.mxu0 }
 0x2c6   : > { %v2272_v16 = vsel %vm1060_vm14, %v986_v13, -inf  ;;  %v978_v18 = vadd.f32 %v2154_v10, %v977_v15 }
 0x2c7   : > { %1093 = vst [vmem:[%s2165_s22 + $0x70] sm:$0xff] %v2272_v16  ;;  %v1661_v19 = vpop.f32.mrf.mxu0 }
 0x2c8   : > { %v2281_v20 = vsel %vm1058_vm0, %v978_v18, -inf  ;;  %v989_v22 = vadd.f32 %v1661_v19, %v2154_v10 }
 0x2c9   : > { %1091 = vst [vmem:[%s2165_s22 + $0x60] sm:$0xff] %v2281_v20  ;;  %v980_v28 = vpop.f32.mrf.mxu0  ;;  %v1103_v5 = vmax.f32 %v1099_v32, %v2281_v20 }
 0x2ca   : > { %v2295_v29 = vsel %vm1061_vm3, %v989_v22, -inf  ;;  %v981_v30 = vadd.f32 %v2154_v10, %v980_v28  ;;  %v1105_v10 = vmax.f32 %v1101_v31, %v2272_v16 }
 0x2cb   : > { %1094 = vst [vmem:[%s2165_s22 + $0x78] sm:$0xff] %v2295_v29  ;;  %v1106_v33 = vmax.f32 %v1102_v27, %v2295_v29 }
 0x2cc   : > { %v2304_v36 = vsel %vm1059_vm4, %v981_v30, -inf }
 0x2cd   : > { %1092 = vst [vmem:[%s2165_s22 + $0x68] sm:$0xff] %v2304_v36  ;;  %v1104_v42 = vmax.f32 %v1100_v41, %v2304_v36  ;;  %v1108_v44 = vmax.f32 %v1105_v10, %v1106_v33 }
 0x2cf   : > { %v1107_v43 = vmax.f32 %v1103_v5, %v1104_v42 }
 0x2d1   : > { %v1109_v46 = vmax.f32 %v1107_v43, %v1108_v44 }
 0x2d3   : > { %1110 = vmax.xlane.f32.xlu0 %v1109_v46 }
 0x35c   : > { %v1111_v47 = vpop.xlane.xlu0 %1110 }
 0x35d   : > { %v1112_v49 = vrot.slane %v1111_v47, 4 }
 0x35f   : > { %v1113_v50 = vmax.f32 %v1111_v47, %v1112_v49 }
 0x361   : > { %v1114_v51 = vrot.slane %v1113_v50, 2 }
 0x363   : > { %v1115_v52 = vmax.f32 %v1113_v50, %v1114_v51 }
 0x365   : > { %v1116_v53 = vrot.slane %v1115_v52, 1 }
 0x367   : > { %v1117_v54 = vmax.f32 %v1115_v52, %v1116_v53 }
 0x369   : > { %1662 = vpush %v1117_v54 }
 0x39a   : > { %s1663_s23 = spop %1662 }
 0x39b   : > { %v2311_v55 = vstv %s1663_s23 }
 0x39c   : > { %v1120_v56 = vsub.f32 %v2171_v17, %v2311_v55  ;;  %v1121_v57 = vsub.f32 %v2185_v24, %v2311_v55  ;;  %v1122_v59 = vsub.f32 %v2162_v14, %v2311_v55  ;;  %v1123_v62 = vsub.f32 %v2179_v21, %v2311_v55 }
 0x39d   : > { %v2325_v2 = vmax.f32 %v2319_v60, %v2311_v55  ;;  %v1124_v17 = vsub.f32 %v2207_v38, %v2311_v55  ;;  %v1125_v14 = vsub.f32 %v2221_v48, %v2311_v55  ;;  %v1126_v24 = vsub.f32 %v2200_v40, %v2311_v55 }
 0x39e   : > { %v1136_v63 = vmul.f32 1.442695, %v1120_v56  ;;  %v1138_v0 = vmul.f32 1.442695, %v1121_v57  ;;  %v1140_v3 = vmul.f32 1.442695, %v1122_v59  ;;  %v1127_v39 = vsub.f32 %v2215_v45, %v2311_v55 }
 0x39f   : > { %1207 = vst.msk [vmem:[#allocation2] sm:$0x1] %vm1205_vm2, %v2325_v2  ;;  %v1142_v21 = vmul.f32 1.442695, %v1123_v62  ;;  %v1144_v7 = vmul.f32 1.442695, %v1124_v17  ;;  %v1196_v8 = vsub.f32 %v2319_v60, %v2325_v2  ;;  %v1200_v38 = vsub.f32 %v2311_v55, %v2325_v2 }
 0x3a0   : > { %1738 = vpow2.f32 %v1136_v63  ;;  %v1146_v9 = vmul.f32 1.442695, %v1125_v14  ;;  %v1128_v48 = vsub.f32 %v2243_v61, %v2311_v55  ;;  %v1148_v34 = vmul.f32 1.442695, %v1126_v24 }
 0x3a1   : > { %1740 = vpow2.f32 %v1138_v0  ;;  %v1129_v40 = vsub.f32 %v2257_v6, %v2311_v55  ;;  %v1150_v11 = vmul.f32 1.442695, %v1127_v39  ;;  %v1130_v12 = vsub.f32 %v2236_v58, %v2311_v55 }
 0x3a2   : > { %1742 = vpow2.f32 %v1140_v3  ;;  %v1152_v13 = vmul.f32 1.442695, %v1128_v48  ;;  %v1131_v45 = vsub.f32 %v2251_v1, %v2311_v55  ;;  %v1132_v61 = vsub.f32 %v2281_v20, %v2311_v55 }
 0x3a3   : > { %1744 = vpow2.f32 %v1142_v21  ;;  %v1154_v18 = vmul.f32 1.442695, %v1129_v40  ;;  %v1156_v19 = vmul.f32 1.442695, %v1130_v12  ;;  %v1133_v23 = vsub.f32 %v2304_v36, %v2311_v55  ;;  %v1194_v40 = vld [vmem:[#allocation3] sm:$0x1] }
 0x3a4   : > { %1746 = vpow2.f32 %v1144_v7  ;;  %v1158_v58 = vmul.f32 1.442695, %v1131_v45  ;;  %v1134_v1 = vsub.f32 %v2272_v16, %v2311_v55  ;;  %v1160_v27 = vmul.f32 1.442695, %v1132_v61 }
 0x3a5   : > { %1748 = vpow2.f32 %v1146_v9  ;;  %v1135_v20 = vsub.f32 %v2295_v29, %v2311_v55  ;;  %v1162_v31 = vmul.f32 1.442695, %v1133_v23  ;;  %v1197_v9 = vmul.f32 1.442695, %v1196_v8 }
 0x3a6   : > { %1750 = vpow2.f32 %v1148_v34  ;;  %v1164_v33 = vmul.f32 1.442695, %v1134_v1  ;;  %v1201_v48 = vmul.f32 1.442695, %v1200_v38 }
 0x3a7   : > { %1752 = vpow2.f32 %v1150_v11  ;;  %v1166_v42 = vmul.f32 1.442695, %v1135_v20 }
 0x3a8   : > { %1754 = vpow2.f32 %v1152_v13 }
 0x3a9   : > { %1756 = vpow2.f32 %v1154_v18 }
 0x3aa   : > { %1758 = vpow2.f32 %v1156_v19 }
 0x3ab   : > { %1760 = vpow2.f32 %v1158_v58 }
 0x3ac   : > { %1762 = vpow2.f32 %v1160_v27 }
 0x3ad   : > { %v1739_v15 = vpop.eup %1738  ;;  %1764 = vpow2.f32 %v1162_v31 }
 0x3ae   : > { %v1741_v4 = vpop.eup %1740  ;;  %1766 = vpow2.f32 %v1164_v33 }
 0x3af   : > { %v1168_v6 = vadd.f32 %v1741_v4, %v1739_v15  ;;  %v1743_v22 = vpop.eup %1742  ;;  %1768 = vpow2.f32 %v1166_v42 }
 0x3b0   : > { %v1745_v26 = vpop.eup %1744  ;;  %1770 = vpow2.f32 %v1197_v9 }
 0x3b1   : > { %v1169_v25 = vadd.f32 %v1743_v22, %v1168_v6  ;;  %v1747_v30 = vpop.eup %1746  ;;  %1772 = vpow2.f32 %v1201_v48 }
 0x3b2   : > { %v1749_v41 = vpop.eup %1748 }
 0x3b3   : > { %v1170_v28 = vadd.f32 %v1745_v26, %v1169_v25  ;;  %v1751_v5 = vpop.eup %1750 }
 0x3b4   : > { %v1753_v43 = vpop.eup %1752 }
 0x3b5   : > { %v1171_v32 = vadd.f32 %v1747_v30, %v1170_v28  ;;  %v1755_v44 = vpop.eup %1754 }
 0x3b6   : > { %v1757_v47 = vpop.eup %1756 }
 0x3b7   : > { %v1172_v36 = vadd.f32 %v1749_v41, %v1171_v32  ;;  %v1759_v29 = vpop.eup %1758 }
 0x3b8   : > { %v1761_v51 = vpop.eup %1760 }
 0x3b9   : > { %v1173_v10 = vadd.f32 %v1751_v5, %v1172_v36  ;;  %v1763_v53 = vpop.eup %1762 }
 0x3ba   : > { %v1765_v56 = vpop.eup %1764 }
 0x3bb   : > { %v1174_v16 = vadd.f32 %v1753_v43, %v1173_v10  ;;  %v1767_v59 = vpop.eup %1766 }
 0x3bc   : > { %v1769_v63 = vpop.eup %1768 }
 0x3bd   : > { %v1175_v46 = vadd.f32 %v1755_v44, %v1174_v16  ;;  %v1771_v34 = vpop.eup %1770 }
 0x3be   : > { %v1773_v11 = vpop.eup %1772  ;;  %v1199_v13 = vmul.f32 %v1771_v34, %v1194_v40 }
 0x3bf   : > { %v1176_v49 = vadd.f32 %v1757_v47, %v1175_v46 }
 0x3c1   : > { %v1177_v50 = vadd.f32 %v1759_v29, %v1176_v49 }
 0x3c3   : > { %v1178_v52 = vadd.f32 %v1761_v51, %v1177_v50 }
 0x3c5   : > { %v1179_v54 = vadd.f32 %v1763_v53, %v1178_v52 }
 0x3c7   : > { %v1180_v57 = vadd.f32 %v1765_v56, %v1179_v54 }
 0x3c9   : > { %v1181_v62 = vadd.f32 %v1767_v59, %v1180_v57 }
 0x3cb   : > { %v1182_v0 = vadd.f32 %v1769_v63, %v1181_v62 }
 0x3cd   : > { %1183 = vadd.xlane.f32.xlu0 %v1182_v0 }
 0x456   : > { %v1184_v17 = vpop.xlane.xlu0 %1183 }
 0x457   : > { %v1185_v3 = vrot.slane %v1184_v17, 4 }
 0x459   : > { %v1186_v14 = vadd.f32 %v1185_v3, %v1184_v17 }
 0x45b   : > { %v1187_v21 = vrot.slane %v1186_v14, 2 }
 0x45d   : > { %v1188_v24 = vadd.f32 %v1187_v21, %v1186_v14 }
 0x45f   : > { %v1189_v7 = vrot.slane %v1188_v24, 1 }
 0x461   : > { %v1190_v39 = vadd.f32 %v1189_v7, %v1188_v24 }
 0x463   : > { %1664 = vpush %v1190_v39 }
 0x494   : > { %s1665_s26 = spop %1664 }
 0x495   : > { %v1192_v12 = vstv %s1665_s26 }
 0x496   : > { %v1203_v15 = vmul.f32 %v1773_v11, %v1192_v12  ;;  %1211 = sbr.rel (%p1544_p2) target bundleno = 1357 (0x54d), region = 60 }
 0x498   : > { %v1204_v45 = vadd.f32 %v1203_v15, %v1199_v13 }
 0x49a   : > { %1206 = vst.msk [vmem:[#allocation3] sm:$0x1] %vm1205_vm2, %v1204_v45 }
 0x49b   : > { %v1545_v60 = vld [vmem:[#allocation2] ss:$0 sm:$0xff]  ;;  %v1913_v18 = vmov 0   ;;  %v1215_v4 = vld [vmem:[#allocation7] sm:$0xff]  ;;  %v1216_v61 = vld [vmem:[#allocation7 + $0x8] sm:$0xff] }
 0x49c   : > { %1774 = vset.pattern.permute.xlu0 %v1913_v18  ;;  %v1217_v19 = vld [vmem:[#allocation7 + $0x10] sm:$0xff]  ;;  %v1218_v6 = vld [vmem:[#allocation7 + $0x18] sm:$0xff]  ;;  %v1219_v22 = vld [vmem:[#allocation7 + $0x20] sm:$0xff] }
 0x49d   : > { %1254 = vperm.xlu0 %1774, %v1545_v60   ;;  %v1220_v23 = vld [vmem:[#allocation7 + $0x28] sm:$0xff]  ;;  %v1221_v1 = vld [vmem:[#allocation7 + $0x30] sm:$0xff]  ;;  %v1222_v35 = vld [vmem:[#allocation7 + $0x38] sm:$0xff] }
 0x49e   : > { %v1223_v28 = vld [vmem:[#allocation7 + $0x40] sm:$0xff]  ;;  %v1224_v30 = vld [vmem:[#allocation7 + $0x48] sm:$0xff]  ;;  %v1225_v36 = vld [vmem:[#allocation7 + $0x50] sm:$0xff] }
 0x49f   : > { %v1226_v10 = vld [vmem:[#allocation7 + $0x58] sm:$0xff]  ;;  %v1227_v44 = vld [vmem:[#allocation7 + $0x60] sm:$0xff]  ;;  %v1228_v49 = vld [vmem:[#allocation7 + $0x68] sm:$0xff] }
 0x4a0   : > { %v1229_v51 = vld [vmem:[#allocation7 + $0x70] sm:$0xff]  ;;  %v1230_v54 = vld [vmem:[#allocation7 + $0x78] sm:$0xff]  ;;  %v1231_v59 = vld [vmem:[#allocation7 + $0x80] sm:$0xff] }
 0x4a1   : > { %v1212_v8 = vld [vmem:[#allocation3] sm:$0x1]  ;;  %v1232_v0 = vld [vmem:[#allocation7 + $0x88] sm:$0xff]  ;;  %v1233_v14 = vld [vmem:[#allocation7 + $0x90] sm:$0xff] }
 0x4a2   : > { %1775 = vrcp.f32 %v1212_v8  ;;  %v1234_v7 = vld [vmem:[#allocation7 + $0x98] sm:$0xff]  ;;  %v1235_v48 = vld [vmem:[#allocation7 + $0xa0] sm:$0xff]  ;;  %v1236_v11 = vld [vmem:[#allocation7 + $0xa8] sm:$0xff] }
 0x4a3   : > { %v1237_v15 = vld [vmem:[#allocation7 + $0xb0] sm:$0xff]  ;;  %v1238_v8 = vld [vmem:[#allocation7 + $0xb8] sm:$0xff] }
 0x4af   : > { %v1776_v55 = vpop.eup %1775 }
 0x4b0   : > { %v1357_v2 = vrot.slane %v1776_v55, %v314_v37 }
 0x4b2   : > { %1359 = vperm.xlu0 %1774, %v1357_v2  }
 0x518   : > { %v2367_v38 = vpop.permute.xlu0 %1254 }
 0x519   : > { %v1257_v58 = vsub.f32 %v1215_v4, %v2367_v38  ;;  %v1258_v25 = vsub.f32 %v1216_v61, %v2367_v38  ;;  %v1259_v26 = vsub.f32 %v1217_v19, %v2367_v38  ;;  %v1260_v27 = vsub.f32 %v1218_v6, %v2367_v38  ;;  %v1239_v4 = vld [vmem:[#allocation7 + $0xc0] sm:$0xff] }
 0x51a   : > { %v1261_v37 = vsub.f32 %v1219_v22, %v2367_v38  ;;  %v1262_v20 = vsub.f32 %v1220_v23, %v2367_v38  ;;  %v1263_v31 = vsub.f32 %v1221_v1, %v2367_v38  ;;  %v1264_v5 = vsub.f32 %v1222_v35, %v2367_v38  ;;  %v1240_v23 = vld [vmem:[#allocation7 + $0xc8] sm:$0xff] }
 0x51b   : > { %v1289_v32 = vmul.f32 1.442695, %v1257_v58  ;;  %v1291_v41 = vmul.f32 1.442695, %v1258_v25  ;;  %v1293_v33 = vmul.f32 1.442695, %v1259_v26  ;;  %v1265_v43 = vsub.f32 %v1223_v28, %v2367_v38 }
 0x51c   : > { %v1295_v42 = vmul.f32 1.442695, %v1260_v27  ;;  %v1297_v16 = vmul.f32 1.442695, %v1261_v37  ;;  %v1266_v46 = vsub.f32 %v1224_v30, %v2367_v38  ;;  %v1299_v47 = vmul.f32 1.442695, %v1262_v20 }
 0x51d   : > { %1777 = vpow2.f32 %v1289_v32  ;;  %v1267_v29 = vsub.f32 %v1225_v36, %v2367_v38  ;;  %v1301_v50 = vmul.f32 1.442695, %v1263_v31  ;;  %v1268_v52 = vsub.f32 %v1226_v10, %v2367_v38  ;;  %v1241_v27 = vld [vmem:[#allocation7 + $0xd0] sm:$0xff]  ;;  %v1242_v20 = vld [vmem:[#allocation7 + $0xd8] sm:$0xff]  ;;  %v1243_v36 = vld [vmem:[#allocation7 + $0xe0] sm:$0xff] }
 0x51e   : > { %1779 = vpow2.f32 %v1291_v41  ;;  %v1303_v53 = vmul.f32 1.442695, %v1264_v5  ;;  %v1269_v56 = vsub.f32 %v1227_v44, %v2367_v38  ;;  %v1305_v57 = vmul.f32 1.442695, %v1265_v43 }
 0x51f   : > { %1781 = vpow2.f32 %v1293_v33  ;;  %v1270_v62 = vsub.f32 %v1228_v49, %v2367_v38  ;;  %v1307_v63 = vmul.f32 1.442695, %v1266_v46  ;;  %v1271_v17 = vsub.f32 %v1229_v51, %v2367_v38 }
 0x520   : > { %1783 = vpow2.f32 %v1295_v42  ;;  %v1309_v3 = vmul.f32 1.442695, %v1267_v29  ;;  %v1272_v21 = vsub.f32 %v1230_v54, %v2367_v38  ;;  %v1311_v24 = vmul.f32 1.442695, %v1268_v52  ;;  %v1245_v29 = vld [vmem:[#allocation7 + $0xf0] sm:$0xff]  ;;  %v1246_v54 = vld [vmem:[#allocation7 + $0xf8] sm:$0xff] }
 0x521   : > { %1785 = vpow2.f32 %v1297_v16  ;;  %v1273_v39 = vsub.f32 %v1231_v59, %v2367_v38  ;;  %v1313_v9 = vmul.f32 1.442695, %v1269_v56  ;;  %v1274_v34 = vsub.f32 %v1232_v0, %v2367_v38  ;;  %v1244_v16 = vld [vmem:[#allocation7 + $0xe8] sm:$0xff] }
 0x522   : > { %1787 = vpow2.f32 %v1299_v47  ;;  %v1315_v40 = vmul.f32 1.442695, %v1270_v62  ;;  %v1275_v12 = vsub.f32 %v1233_v14, %v2367_v38  ;;  %v1317_v13 = vmul.f32 1.442695, %v1271_v17 }
 0x523   : > { %1789 = vpow2.f32 %v1301_v50  ;;  %v1276_v45 = vsub.f32 %v1234_v7, %v2367_v38  ;;  %v1319_v60 = vmul.f32 1.442695, %v1272_v21  ;;  %v1277_v18 = vsub.f32 %v1235_v48, %v2367_v38 }
 0x524   : > { %1791 = vpow2.f32 %v1303_v53  ;;  %v1321_v55 = vmul.f32 1.442695, %v1273_v39  ;;  %v1278_v61 = vsub.f32 %v1236_v11, %v2367_v38  ;;  %v1323_v19 = vmul.f32 1.442695, %v1274_v34 }
 0x525   : > { %1793 = vpow2.f32 %v1305_v57  ;;  %v1279_v58 = vsub.f32 %v1237_v15, %v2367_v38  ;;  %v1325_v25 = vmul.f32 1.442695, %v1275_v12  ;;  %v1280_v35 = vsub.f32 %v1238_v8, %v2367_v38 }
 0x526   : > { %1795 = vpow2.f32 %v1307_v63  ;;  %v1327_v37 = vmul.f32 1.442695, %v1276_v45  ;;  %v1281_v31 = vsub.f32 %v1239_v4, %v2367_v38  ;;  %v1329_v32 = vmul.f32 1.442695, %v1277_v18 }
 0x527   : > { %1797 = vpow2.f32 %v1309_v3  ;;  %v1282_v5 = vsub.f32 %v1240_v23, %v2367_v38  ;;  %v1331_v42 = vmul.f32 1.442695, %v1278_v61  ;;  %v1283_v44 = vsub.f32 %v1241_v27, %v2367_v38 }
 0x528   : > { %1799 = vpow2.f32 %v1311_v24  ;;  %v1333_v46 = vmul.f32 1.442695, %v1279_v58  ;;  %v1284_v50 = vsub.f32 %v1242_v20, %v2367_v38  ;;  %v1335_v51 = vmul.f32 1.442695, %v1280_v35 }
 0x529   : > { %1801 = vpow2.f32 %v1313_v9  ;;  %v1285_v56 = vsub.f32 %v1243_v36, %v2367_v38  ;;  %v1337_v57 = vmul.f32 1.442695, %v1281_v31  ;;  %v1286_v63 = vsub.f32 %v1244_v16, %v2367_v38 }
 0x52a   : > { %v1778_v2 = vpop.eup %1777  ;;  %1803 = vpow2.f32 %v1315_v40  ;;  %v1339_v0 = vmul.f32 1.442695, %v1282_v5  ;;  %v1287_v14 = vsub.f32 %v1245_v29, %v2367_v38  ;;  %v1341_v21 = vmul.f32 1.442695, %v1283_v44 }
 0x52b   : > { %v1780_v22 = vpop.eup %1779  ;;  %1805 = vpow2.f32 %v1317_v13  ;;  %v1288_v39 = vsub.f32 %v1246_v54, %v2367_v38  ;;  %v1343_v9 = vmul.f32 1.442695, %v1284_v50  ;;  %v1345_v40 = vmul.f32 1.442695, %v1285_v56 }
 0x52c   : > { %v1782_v1 = vpop.eup %1781  ;;  %1807 = vpow2.f32 %v1319_v60  ;;  %v1347_v13 = vmul.f32 1.442695, %v1286_v63  ;;  %v1349_v38 = vmul.f32 1.442695, %v1287_v14 }
 0x52d   : > { %v2391_v6 = vpop.permute.xlu0 %1359  ;;  %v1784_v30 = vpop.eup %1783  ;;  %1809 = vpow2.f32 %v1321_v55  ;;  %v1351_v18 = vmul.f32 1.442695, %v1288_v39 }
 0x52e   : > { %v1362_v26 = vmul.f32 %v1778_v2, %v2391_v6  ;;  %v1363_v28 = vmul.f32 %v1780_v22, %v2391_v6  ;;  %v1364_v41 = vmul.f32 %v1782_v1, %v2391_v6  ;;  %v1786_v33 = vpop.eup %1785  ;;  %1811 = vpow2.f32 %v1323_v19 }
 0x52f   : > { %v1365_v10 = vmul.f32 %v1784_v30, %v2391_v6  ;;  %v1788_v43 = vpop.eup %1787  ;;  %1813 = vpow2.f32 %v1325_v25  ;;  %v1366_v47 = vmul.f32 %v1786_v33, %v2391_v6 }
 0x530   : > { %1394 = vst [vmem:[#allocation7] sm:$0xff] %v1362_v26  ;;  %1395 = vst [vmem:[#allocation7 + $0x8] sm:$0xff] %v1363_v28  ;;  %v1790_v49 = vpop.eup %1789  ;;  %1815 = vpow2.f32 %v1327_v37  ;;  %v1367_v52 = vmul.f32 %v1788_v43, %v2391_v6 }
 0x531   : > { %1396 = vst [vmem:[#allocation7 + $0x10] sm:$0xff] %v1364_v41  ;;  %1397 = vst [vmem:[#allocation7 + $0x18] sm:$0xff] %v1365_v10  ;;  %v1792_v53 = vpop.eup %1791  ;;  %1817 = vpow2.f32 %v1329_v32  ;;  %v1368_v59 = vmul.f32 %v1790_v49, %v2391_v6 }
 0x532   : > { %1398 = vst [vmem:[#allocation7 + $0x20] sm:$0xff] %v1366_v47  ;;  %v1794_v62 = vpop.eup %1793  ;;  %1819 = vpow2.f32 %v1331_v42  ;;  %v1369_v17 = vmul.f32 %v1792_v53, %v2391_v6  ;;  %1399 = vst [vmem:[#allocation7 + $0x28] sm:$0xff] %v1367_v52 }
 0x533   : > { %v1796_v3 = vpop.eup %1795  ;;  %1821 = vpow2.f32 %v1333_v46  ;;  %v1370_v24 = vmul.f32 %v1794_v62, %v2391_v6  ;;  %1400 = vst [vmem:[#allocation7 + $0x30] sm:$0xff] %v1368_v59 }
 0x534   : > { %v1798_v7 = vpop.eup %1797  ;;  %1823 = vpow2.f32 %v1335_v51  ;;  %v1371_v48 = vmul.f32 %v1796_v3, %v2391_v6  ;;  %1401 = vst [vmem:[#allocation7 + $0x38] sm:$0xff] %v1369_v17 }
 0x535   : > { %v1800_v34 = vpop.eup %1799  ;;  %1825 = vpow2.f32 %v1337_v57  ;;  %v1372_v11 = vmul.f32 %v1798_v7, %v2391_v6  ;;  %1402 = vst [vmem:[#allocation7 + $0x40] sm:$0xff] %v1370_v24 }
 0x536   : > { %v1802_v12 = vpop.eup %1801  ;;  %1827 = vpow2.f32 %v1339_v0  ;;  %v1373_v15 = vmul.f32 %v1800_v34, %v2391_v6  ;;  %1403 = vst [vmem:[#allocation7 + $0x48] sm:$0xff] %v1371_v48 }
 0x537   : > { %v1804_v45 = vpop.eup %1803  ;;  %1829 = vpow2.f32 %v1341_v21  ;;  %v1374_v60 = vmul.f32 %v1802_v12, %v2391_v6  ;;  %1404 = vst [vmem:[#allocation7 + $0x50] sm:$0xff] %v1372_v11 }
 0x538   : > { %v1806_v8 = vpop.eup %1805  ;;  %1831 = vpow2.f32 %v1343_v9  ;;  %v1375_v55 = vmul.f32 %v1804_v45, %v2391_v6  ;;  %1405 = vst [vmem:[#allocation7 + $0x58] sm:$0xff] %v1373_v15 }
 0x539   : > { %v1808_v2 = vpop.eup %1807  ;;  %1833 = vpow2.f32 %v1345_v40  ;;  %v1376_v4 = vmul.f32 %v1806_v8, %v2391_v6  ;;  %1406 = vst [vmem:[#allocation7 + $0x60] sm:$0xff] %v1374_v60 }
 0x53a   : > { %v1810_v61 = vpop.eup %1809  ;;  %1835 = vpow2.f32 %v1347_v13  ;;  %v1377_v19 = vmul.f32 %v1808_v2, %v2391_v6  ;;  %1407 = vst [vmem:[#allocation7 + $0x68] sm:$0xff] %v1375_v55 }
 0x53b   : > { %v1812_v22 = vpop.eup %1811  ;;  %1837 = vpow2.f32 %v1349_v38  ;;  %v1378_v23 = vmul.f32 %v1810_v61, %v2391_v6  ;;  %1408 = vst [vmem:[#allocation7 + $0x70] sm:$0xff] %v1376_v4 }
 0x53c   : > { %v1814_v58 = vpop.eup %1813  ;;  %1839 = vpow2.f32 %v1351_v18  ;;  %v1379_v25 = vmul.f32 %v1812_v22, %v2391_v6  ;;  %1409 = vst [vmem:[#allocation7 + $0x78] sm:$0xff] %v1377_v19 }
 0x53d   : > { %v1816_v26 = vpop.eup %1815  ;;  %v1380_v1 = vmul.f32 %v1814_v58, %v2391_v6  ;;  %1410 = vst [vmem:[#allocation7 + $0x80] sm:$0xff] %v1378_v23 }
 0x53e   : > { %v1818_v27 = vpop.eup %1817  ;;  %v1381_v35 = vmul.f32 %v1816_v26, %v2391_v6  ;;  %1411 = vst [vmem:[#allocation7 + $0x88] sm:$0xff] %v1379_v25 }
 0x53f   : > { %v1820_v37 = vpop.eup %1819  ;;  %v1382_v28 = vmul.f32 %v1818_v27, %v2391_v6  ;;  %1412 = vst [vmem:[#allocation7 + $0x90] sm:$0xff] %v1380_v1 }
 0x540   : > { %v1822_v30 = vpop.eup %1821  ;;  %v1383_v20 = vmul.f32 %v1820_v37, %v2391_v6  ;;  %1413 = vst [vmem:[#allocation7 + $0x98] sm:$0xff] %v1381_v35 }
 0x541   : > { %v1824_v31 = vpop.eup %1823  ;;  %v1384_v32 = vmul.f32 %v1822_v30, %v2391_v6  ;;  %1414 = vst [vmem:[#allocation7 + $0xa0] sm:$0xff] %v1382_v28 }
 0x542   : > { %v1826_v41 = vpop.eup %1825  ;;  %v1385_v33 = vmul.f32 %v1824_v31, %v2391_v6  ;;  %1415 = vst [vmem:[#allocation7 + $0xa8] sm:$0xff] %v1383_v20 }
 0x543   : > { %v1828_v36 = vpop.eup %1827  ;;  %v1386_v5 = vmul.f32 %v1826_v41, %v2391_v6  ;;  %1416 = vst [vmem:[#allocation7 + $0xb0] sm:$0xff] %v1384_v32 }
 0x544   : > { %v1830_v42 = vpop.eup %1829  ;;  %v1387_v10 = vmul.f32 %v1828_v36, %v2391_v6  ;;  %1417 = vst [vmem:[#allocation7 + $0xb8] sm:$0xff] %v1385_v33 }
 0x545   : > { %v1832_v43 = vpop.eup %1831  ;;  %v1388_v16 = vmul.f32 %v1830_v42, %v2391_v6  ;;  %1418 = vst [vmem:[#allocation7 + $0xc0] sm:$0xff] %v1386_v5 }
 0x546   : > { %v1834_v44 = vpop.eup %1833  ;;  %v1389_v46 = vmul.f32 %v1832_v43, %v2391_v6  ;;  %1419 = vst [vmem:[#allocation7 + $0xc8] sm:$0xff] %v1387_v10 }
 0x547   : > { %v1836_v47 = vpop.eup %1835  ;;  %v1390_v49 = vmul.f32 %v1834_v44, %v2391_v6  ;;  %1420 = vst [vmem:[#allocation7 + $0xd0] sm:$0xff] %v1388_v16 }
 0x548   : > { %v1838_v29 = vpop.eup %1837  ;;  %v1391_v50 = vmul.f32 %v1836_v47, %v2391_v6  ;;  %1421 = vst [vmem:[#allocation7 + $0xd8] sm:$0xff] %v1389_v46 }
 0x549   : > { %v1840_v51 = vpop.eup %1839  ;;  %v1392_v52 = vmul.f32 %v1838_v29, %v2391_v6  ;;  %1422 = vst [vmem:[#allocation7 + $0xe0] sm:$0xff] %v1390_v49 }
 0x54a   : > { %v1393_v53 = vmul.f32 %v1840_v51, %v2391_v6  ;;  %1423 = vst [vmem:[#allocation7 + $0xe8] sm:$0xff] %v1391_v50 }
 0x54b   : > { %1424 = vst [vmem:[#allocation7 + $0xf0] sm:$0xff] %v1392_v52 }
 0x54c   : > { %1425 = vst [vmem:[#allocation7 + $0xf8] sm:$0xff] %v1393_v53 }
 0x54d PF: > { %p1680_p3 = scmp.eq.s32.totalorder %s1963_s25, 1  ;;  %s1914_s27 = smov [#allocation7]  }
 0x54e   : > { %s1432_s28 = sshll.u32 %s1914_s27, 4  ;;  %s1433_s28 = int_to_ptr.vmem [resolvable:$true] %s1432_s28 }
 0x54f   : > { %s1867_s29 = scalar_lea.vmem %s1433_s28, 4096  ;;  %p1874_p7 = scmp.lt.s32.totalorder %s1433_s28, %s1433_s28 }
 0x550   : > { %p1868_p4 = scmp.ne.s32.totalorder %s1433_s28, %s1867_s29  ;;  %p1875_p8 = scmp.lt.s32.totalorder %s1867_s29, %s1867_s29 }
 0x552   : > { %p1869_p5 = pnand %p1868_p4, %p1680_p3  ;;  %p1876_p9 = por %p1875_p8, %p1874_p7 }
 0x554   : > { %p1870_p6 = pneg %p1869_p5 }
 0x556   : > { %p1877_p10 = pnand %p1876_p9, %p1870_p6 }
 0x558   : > { %1880 = shalt.err (!%p1877_p10)
}
 0x559   : > { %s1915_s30 = smov 128   ;;  %s1916_s8 = smov 8  }
 0x55a   : > { %1671 = dma.vmem_to_hbm [thread:$0]  (%p1680_p3), %s1433_s28, 4096, %s2457_s7, [#allocation6], %s1915_s30, %s1915_s30, %s1916_s8  }
 0x55b   : > { %1900 = dma.done.wait (%p1680_p3), [#allocation6], 4096  }
 0x55c   : > { %1902 = vsyncadd (%p1680_p3), [#allocation6], 4294963200 }
 0x55d PF: > { %s19_s24 = sadd.s32 1, %s1905_s24  }
 0x55e   : > { %p16_p11 = scmp.ge.s32.totalorder %s19_s24, 4  }
 0x560   :  { %18 = sbr.rel (!%p16_p11) target bundleno = 2 (0x2), region = 89 }
 0x565   :  { %1448 = vsyncpa [#allocation5], 1 }
 0x566   :  { %1450 = vsyncpa [#allocation5 + $0x1], 1 }
 0x567   :  { %1451 = vsyncpa [#allocation6], 1 }
 0x568   :  { %1453 = vsyncpa [#allocation6 + $0x1], 1 }

</bundles_post_ra>
